<compile_context>
chip_gen: v5e
topology: v5e:2x2
jax: 0.10.0
libtpu: 0.0.40
codegen_flags: <defaults>
</compile_context>

<pallas_src>
import jax
import jax.numpy as jnp
from jax.experimental import pallas as pl
from jax.experimental.pallas import tpu as pltpu

NUM_HEADS = 3
V = 21    # nodes per group; the PyTorch forward hard-codes 21
VP = 24   # padded nodes per group (multiple of 8 -> sublane aligned)


def gat_fused_kernel(x_ref, wproj_ref, waux_ref, amask_ref, sel_ref, o_ref):
    # x_ref:     (GT*VP, Cin)    zero-padded node features, node-major
    # wproj_ref: (Cin, H*C)      head-fused projection weight (torch W^T)
    # waux_ref:  (Cin, C+2H)     [skip (= 1/H head-mean of proj) | src scores | tgt scores]
    # amask_ref: (VP, VP)        adjacency values + (-1e30) mask, padded
    # sel_ref:   (V, H*VP+VP)    torch's raw (G*H,21,C)->(G*21,3,C) view + head-mean
    #                            (1/H folded in) + identity block for the skip term
    # o_ref:     (GT, V, C)      final per-group outputs
    GT, Vout, C = o_ref.shape
    VPn = amask_ref.shape[0]
    H = wproj_ref.shape[1] // C
    f32 = jnp.float32

    x2 = x_ref[...]                                                      # (GT*VP, Cin)

    # everything that is linear in x comes out of two flat MXU matmuls
    proj = jnp.dot(x2, wproj_ref[...], preferred_element_type=f32)       # (GT*VP, H*C)
    aux = jnp.dot(x2, waux_ref[...], preferred_element_type=f32)         # (GT*VP, C+2H)

    skip = aux[:, :C].reshape(GT, VPn, C)                                # (GT, VP, C)
    src = aux[:, C:C + H].reshape(GT, VPn, H)                            # (GT, VP, H)
    tgt = aux[:, C + H:C + 2 * H].reshape(GT, VPn, H)                    # (GT, VP, H)

    amask = amask_ref[...][None, :, :]                                   # (1, VP, VP)
    ones = jnp.ones((GT, VPn, 1), f32)                                   # hoisted

    parts = []
    for h in range(H):  # static, tiny loop; every op below is batched over all GT groups
        # outer-sum src_i + tgt_j via a rank-2 batched matmul (MXU handles the transpose)
        u = jnp.concatenate([src[:, :, h:h + 1], ones], axis=-1)         # (GT, VP, 2)
        t = jnp.concatenate([ones, tgt[:, :, h:h + 1]], axis=-1)         # (GT, VP, 2)
        s = jnp.einsum('gif,gjf->gij', u, t,
                       preferred_element_type=f32)                       # (GT, VP, VP)
        s = jnp.where(s >= 0.0, s, 0.2 * s)                              # LeakyReLU(0.2)
        logit = s + amask                                                # torch adds A itself
        m = jnp.max(logit, axis=-1, keepdims=True)
        e = jnp.exp(logit - m)
        attn = e * pl.reciprocal(jnp.sum(e, axis=-1, keepdims=True), approx=True)
        ph = proj[:, h * C:(h + 1) * C].reshape(GT, VPn, C)              # (GT, VP, C)
        parts.append(jnp.einsum('gij,gjc->gic', attn, ph,
                                preferred_element_type=f32))             # (GT, VP, C)
    parts.append(skip)
    agg = jnp.concatenate(parts, axis=1)                                 # (GT, H*VP+VP, C)

    # one batched selector matmul does the scrambled view + head mean + skip add
    sel = jnp.broadcast_to(sel_ref[...][None, :, :], (GT, Vout, agg.shape[1]))
    out = jnp.einsum('gvj,gjc->gvc', sel, agg, preferred_element_type=f32)  # (GT, V, C)

    o_ref[...] = out.astype(o_ref.dtype)                                 # one contiguous store


def gat_forward(x, A, W, a_src, a_tgt):
    """x: (B, Cin, T, V) float32 NCHW, A: (V, V) adjacency.
       W: (3*C, Cin) torch Linear weight, a_src/a_tgt: (1, 3, C)."""
    B, Cin, T, Vv = x.shape
    assert Vv == V, "forward hard-codes V == 21"
    H = NUM_HEADS
    C = W.shape[0] // H
    G = B * T
    N = G * V
    f32 = jnp.float32

    # fixed, VMEM-bounded group tile; >= 4 grid steps when possible so the BlockSpec
    # double-buffer actually pipelines, and >= 2 so v7x megacore can split the grid.
    g_tile = min(G, max(2, min(32, -(-G // 4))))
    num_steps = -(-G // g_tile)
    G_pad = num_steps * g_tile

    # --- glue: torch permute(0,2,3,1) + 21-node grouping, zero-padded to (G_pad, VP) ---
    x_nodes = jnp.transpose(x, (0, 2, 3, 1)).reshape(G, V, Cin).astype(f32)
    x_pad = jnp.zeros((G_pad, VP, Cin), f32).at[:G, :V, :].set(x_nodes)
    x_flat = x_pad.reshape(G_pad * VP, Cin)

    # --- fold every linear piece into two matmul weights ---
    W_f = W.astype(f32)                          # (H*C, Cin)
    W_all = W_f.T                                # (Cin, H*C)
    W_heads = W_f.reshape(H, C, Cin)             # (H, C, Cin)
    W_skip = jnp.mean(W_heads, axis=0).T         # (Cin, C): skip = head-mean of proj
    a_src_h = a_src.reshape(H, C).astype(f32)
    a_tgt_h = a_tgt.reshape(H, C).astype(f32)
    W_src = jnp.einsum('hck,hc->kh', W_heads, a_src_h)    # (Cin, H)
    W_tgt = jnp.einsum('hck,hc->kh', W_heads, a_tgt_h)    # (Cin, H)
    W_aux = jnp.concatenate([W_skip, W_src, W_tgt], axis=1)   # (Cin, C+2H)

    # --- adjacency mask: torch adds A itself to logits, zeros -> -1e30 (finite) ---
    A_f = A.astype(f32)
    A_m = jnp.where(A_f == 0.0, jnp.float32(-1e30), A_f)
    amask = jnp.full((VP, VP), jnp.float32(-1e30)).at[:V, :V].set(A_m)

    # --- selector reproducing torch's raw (G*H,21,C)->(G*21,3,C) view + mean(dim=1),
    #     with an identity block appended so the skip term rides the same matmul ---
    f_idx = jnp.arange(H * V)
    head = f_idx // V
    node = f_idx % V
    col = head * VP + node            # row in the head-major padded agg block
    row = f_idx // H                  # output node this flat index contributes to
    sel_main = jnp.zeros((V, H * VP), f32).at[row, col].add(1.0 / H)
    sel_skip = jnp.zeros((V, VP), f32).at[jnp.arange(V), jnp.arange(V)].set(1.0)
    sel = jnp.concatenate([sel_main, sel_skip], axis=1)        # (V, H*VP+VP)

    cost = pl.CostEstimate(
        flops=int(2 * G_pad * VP * Cin * (H * C + C + 2 * H)
                  + G_pad * H * (2 * VP * VP * 2 + 2 * VP * VP * C + 6 * VP * VP)
                  + G_pad * 2 * V * (H * VP + VP) * C),
        transcendentals=int(G_pad * H * VP * VP),
        bytes_accessed=int(4 * (x_flat.size + G_pad * V * C + W_all.size
                                + W_aux.size + amask.size + sel.size)),
    )

    out_pad = pl.pallas_call(
        gat_fused_kernel,
        out_shape=jax.ShapeDtypeStruct((G_pad, V, C), f32),
        grid_spec=pltpu.PrefetchScalarGridSpec(
            num_scalar_prefetch=0,
            grid=(num_steps,),
            in_specs=[
                pl.BlockSpec((g_tile * VP, Cin), lambda i: (i, 0)),
                pl.BlockSpec((Cin, H * C), lambda i: (0, 0)),
                pl.BlockSpec((Cin, C + 2 * H), lambda i: (0, 0)),
                pl.BlockSpec((VP, VP), lambda i: (0, 0)),
                pl.BlockSpec((V, H * VP + VP), lambda i: (0, 0)),
            ],
            out_specs=pl.BlockSpec((g_tile, V, C), lambda i: (i, 0, 0)),
        ),
        compiler_params=pltpu.CompilerParams(
            dimension_semantics=("parallel",),
            vmem_limit_bytes=32 * 1024 * 1024,
        ),
        cost_estimate=cost,
    )(x_flat, W_all, W_aux, amask, sel)

    # drop group padding; final torch `.view(batch, c_out, t, v)` is a raw
    # reinterpretation of the contiguous (N, C) buffer.
    out_flat = out_pad[:G].reshape(N, C)
    return out_flat.reshape(B, C, T, V)


if __name__ == "__main__":
    B, Cin, T, C_out = 2, 4, 8, 16   # small shapes; V is fixed to 21 by the module

    key = jax.random.PRNGKey(0)
    kw, ks, kt, kx, ka = jax.random.split(key, 5)

    # deterministic xavier-uniform-style parameter init (shapes from __init__)
    bw = (6.0 / (Cin + NUM_HEADS * C_out)) ** 0.5
    W = jax.random.uniform(kw, (NUM_HEADS * C_out, Cin), jnp.float32, -bw, bw)
    bs = (6.0 / (NUM_HEADS * C_out + C_out)) ** 0.5
    a_src = jax.random.uniform(ks, (1, NUM_HEADS, C_out), jnp.float32, -bs, bs)
    a_tgt = jax.random.uniform(kt, (1, NUM_HEADS, C_out), jnp.float32, -bs, bs)

    # inputs: x in NCHW, A a 21x21 adjacency with self-loops (valid softmax rows)
    x = jax.random.normal(kx, (B, Cin, T, V), jnp.float32)
    A_rand = (jax.random.uniform(ka, (V, V)) > 0.6).astype(jnp.float32)
    A = jnp.maximum(A_rand, jnp.eye(V, dtype=jnp.float32))

    out = jax.jit(gat_forward)(x, A, W, a_src, a_tgt)
    out = jax.block_until_ready(out)

    assert out.shape == (B, C_out, T, V)
    assert bool(jnp.all(jnp.isfinite(out)))
    print("KERNEL_OK")
</pallas_src>

<mosaic_0001>
module attributes {stable_mosaic.version = 11 : i64} {
  func.func @gat_fused_kernel(%arg0: i32, %arg1: memref<96x4xf32, #tpu.memory_space<vmem>>, %arg2: memref<4x48xf32, #tpu.memory_space<vmem>>, %arg3: memref<4x22xf32, #tpu.memory_space<vmem>>, %arg4: memref<24x24xf32, #tpu.memory_space<vmem>>, %arg5: memref<21x96xf32, #tpu.memory_space<vmem>>, %arg6: memref<4x21x16xf32, #tpu.memory_space<vmem>>) attributes {dimension_semantics = [#tpu.dimension_semantics<parallel>], iteration_bounds = array<i64: 4>, scalar_prefetch = 0 : i64, scratch_operands = 0 : i64, tpu.core_type = #tpu.core_type<tc>, window_params = [{transform_indices = @transform_0, window_bounds = array<i64: 96, 4>}, {pipeline_mode = #tpu.pipeline_mode<synchronous>, transform_indices = @transform_1, window_bounds = array<i64: 4, 48>}, {pipeline_mode = #tpu.pipeline_mode<synchronous>, transform_indices = @transform_2, window_bounds = array<i64: 4, 22>}, {pipeline_mode = #tpu.pipeline_mode<synchronous>, transform_indices = @transform_3, window_bounds = array<i64: 24, 24>}, {pipeline_mode = #tpu.pipeline_mode<synchronous>, transform_indices = @transform_4, window_bounds = array<i64: 21, 96>}, {transform_indices = @transform_5, window_bounds = array<i64: 4, 21, 16>}]} {
    %c0 = arith.constant 0 : index
    %c0_0 = arith.constant 0 : index
    %0 = vector.load %arg1[%c0, %c0_0] : memref<96x4xf32, #tpu.memory_space<vmem>>, vector<96x4xf32>
    %c0_1 = arith.constant 0 : index
    %c0_2 = arith.constant 0 : index
    %1 = vector.load %arg2[%c0_1, %c0_2] : memref<4x48xf32, #tpu.memory_space<vmem>>, vector<4x48xf32>
    %cst = arith.constant dense<0.000000e+00> : vector<96x48xf32>
    %2 = tpu.matmul %0, %1, %cst {dimension_numbers = #tpu.dot_dimension_numbers<[1], [0], [0], [1], [0, 0, 1, 1], [], []>} : vector<96x4xf32>, vector<4x48xf32>, vector<96x48xf32> -> vector<96x48xf32>
    %c0_3 = arith.constant 0 : index
    %c0_4 = arith.constant 0 : index
    %3 = vector.load %arg3[%c0_3, %c0_4] : memref<4x22xf32, #tpu.memory_space<vmem>>, vector<4x22xf32>
    %cst_5 = arith.constant dense<0.000000e+00> : vector<96x22xf32>
    %4 = tpu.matmul %0, %3, %cst_5 {dimension_numbers = #tpu.dot_dimension_numbers<[1], [0], [0], [1], [0, 0, 1, 1], [], []>} : vector<96x4xf32>, vector<4x22xf32>, vector<96x22xf32> -> vector<96x22xf32>
    %5 = vector.extract_strided_slice %4 {offsets = [0, 0], sizes = [96, 16], strides = [1, 1]} : vector<96x22xf32> to vector<96x16xf32>
    %6 = vector.shape_cast %5 : vector<96x16xf32> to vector<4x24x16xf32>
    %7 = vector.extract_strided_slice %4 {offsets = [0, 16], sizes = [96, 3], strides = [1, 1]} : vector<96x22xf32> to vector<96x3xf32>
    %8 = vector.shape_cast %7 : vector<96x3xf32> to vector<4x24x3xf32>
    %9 = vector.extract_strided_slice %4 {offsets = [0, 19], sizes = [96, 3], strides = [1, 1]} : vector<96x22xf32> to vector<96x3xf32>
    %10 = vector.shape_cast %9 : vector<96x3xf32> to vector<4x24x3xf32>
    %c0_6 = arith.constant 0 : index
    %c0_7 = arith.constant 0 : index
    %11 = vector.load %arg4[%c0_6, %c0_7] : memref<24x24xf32, #tpu.memory_space<vmem>>, vector<24x24xf32>
    %12 = vector.shape_cast %11 : vector<24x24xf32> to vector<1x24x24xf32>
    %cst_8 = arith.constant 1.000000e+00 : f32
    %13 = vector.broadcast %cst_8 : f32 to vector<4x24x1xf32>
    %14 = vector.extract_strided_slice %8 {offsets = [0, 0, 0], sizes = [4, 24, 1], strides = [1, 1, 1]} : vector<4x24x3xf32> to vector<4x24x1xf32>
    %15 = tpu.concatenate %14, %13 in 2 : vector<4x24x1xf32>, vector<4x24x1xf32> -> vector<4x24x2xf32>
    %16 = vector.extract_strided_slice %10 {offsets = [0, 0, 0], sizes = [4, 24, 1], strides = [1, 1, 1]} : vector<4x24x3xf32> to vector<4x24x1xf32>
    %17 = tpu.concatenate %13, %16 in 2 : vector<4x24x1xf32>, vector<4x24x1xf32> -> vector<4x24x2xf32>
    "tpu.trace_start"() <{level = 10 : i32, message = "gif,gjf->gij"}> : () -> ()
    %cst_9 = arith.constant dense<0.000000e+00> : vector<4x24x24xf32>
    %18 = tpu.matmul %15, %17, %cst_9 {dimension_numbers = #tpu.dot_dimension_numbers<[2], [2], [1], [1], [0, 0, 0, 1, 1, 1], [0], [0]>} : vector<4x24x2xf32>, vector<4x24x2xf32>, vector<4x24x24xf32> -> vector<4x24x24xf32>
    %cst_10 = arith.constant 0.000000e+00 : f32
    "tpu.trace_stop"() : () -> ()
    %19 = vector.broadcast %cst_10 : f32 to vector<4x24x24xf32>
    %20 = arith.cmpf oge, %18, %19 : vector<4x24x24xf32>
    %cst_11 = arith.constant 2.000000e-01 : f32
    %21 = vector.broadcast %cst_11 : f32 to vector<4x24x24xf32>
    %22 = arith.mulf %21, %18 : vector<4x24x24xf32>
    %23 = arith.select %20, %18, %22 : vector<4x24x24xi1>, vector<4x24x24xf32>
    %24 = vector.broadcast %12 : vector<1x24x24xf32> to vector<4x24x24xf32>
    %25 = arith.addf %23, %24 : vector<4x24x24xf32>
    %cst_12 = arith.constant dense<0xFF800000> : vector<4x24xf32>
    %26 = vector.multi_reduction <maximumf>, %25, %cst_12 [2] : vector<4x24x24xf32> to vector<4x24xf32>
    %27 = vector.shape_cast %26 : vector<4x24xf32> to vector<4x24x1xf32>
    %28 = vector.broadcast %27 : vector<4x24x1xf32> to vector<4x24x24xf32>
    %29 = arith.subf %25, %28 : vector<4x24x24xf32>
    %30 = math.exp %29 : vector<4x24x24xf32>
    %cst_13 = arith.constant dense<0.000000e+00> : vector<4x24xf32>
    %31 = vector.multi_reduction <add>, %30, %cst_13 [2] : vector<4x24x24xf32> to vector<4x24xf32>
    %32 = vector.shape_cast %31 : vector<4x24xf32> to vector<4x24x1xf32>
    %33 = tpu.reciprocal %32 {approx = true} : vector<4x24x1xf32> -> vector<4x24x1xf32>
    %34 = vector.broadcast %33 : vector<4x24x1xf32> to vector<4x24x24xf32>
    %35 = arith.mulf %30, %34 : vector<4x24x24xf32>
    %36 = vector.extract_strided_slice %2 {offsets = [0, 0], sizes = [96, 16], strides = [1, 1]} : vector<96x48xf32> to vector<96x16xf32>
    %37 = vector.shape_cast %36 : vector<96x16xf32> to vector<4x24x16xf32>
    "tpu.trace_start"() <{level = 10 : i32, message = "gij,gjc->gic"}> : () -> ()
    %cst_14 = arith.constant dense<0.000000e+00> : vector<4x24x16xf32>
    %38 = tpu.matmul %35, %37, %cst_14 {dimension_numbers = #tpu.dot_dimension_numbers<[2], [1], [1], [2], [0, 0, 0, 1, 1, 2], [0], [0]>} : vector<4x24x24xf32>, vector<4x24x16xf32>, vector<4x24x16xf32> -> vector<4x24x16xf32>
    "tpu.trace_stop"() : () -> ()
    %39 = vector.extract_strided_slice %8 {offsets = [0, 0, 1], sizes = [4, 24, 1], strides = [1, 1, 1]} : vector<4x24x3xf32> to vector<4x24x1xf32>
    %40 = tpu.concatenate %39, %13 in 2 : vector<4x24x1xf32>, vector<4x24x1xf32> -> vector<4x24x2xf32>
    %41 = vector.extract_strided_slice %10 {offsets = [0, 0, 1], sizes = [4, 24, 1], strides = [1, 1, 1]} : vector<4x24x3xf32> to vector<4x24x1xf32>
    %42 = tpu.concatenate %13, %41 in 2 : vector<4x24x1xf32>, vector<4x24x1xf32> -> vector<4x24x2xf32>
    "tpu.trace_start"() <{level = 10 : i32, message = "gif,gjf->gij"}> : () -> ()
    %cst_15 = arith.constant dense<0.000000e+00> : vector<4x24x24xf32>
    %43 = tpu.matmul %40, %42, %cst_15 {dimension_numbers = #tpu.dot_dimension_numbers<[2], [2], [1], [1], [0, 0, 0, 1, 1, 1], [0], [0]>} : vector<4x24x2xf32>, vector<4x24x2xf32>, vector<4x24x24xf32> -> vector<4x24x24xf32>
    %cst_16 = arith.constant 0.000000e+00 : f32
    "tpu.trace_stop"() : () -> ()
    %44 = vector.broadcast %cst_16 : f32 to vector<4x24x24xf32>
    %45 = arith.cmpf oge, %43, %44 : vector<4x24x24xf32>
    %cst_17 = arith.constant 2.000000e-01 : f32
    %46 = vector.broadcast %cst_17 : f32 to vector<4x24x24xf32>
    %47 = arith.mulf %46, %43 : vector<4x24x24xf32>
    %48 = arith.select %45, %43, %47 : vector<4x24x24xi1>, vector<4x24x24xf32>
    %49 = vector.broadcast %12 : vector<1x24x24xf32> to vector<4x24x24xf32>
    %50 = arith.addf %48, %49 : vector<4x24x24xf32>
    %cst_18 = arith.constant dense<0xFF800000> : vector<4x24xf32>
    %51 = vector.multi_reduction <maximumf>, %50, %cst_18 [2] : vector<4x24x24xf32> to vector<4x24xf32>
    %52 = vector.shape_cast %51 : vector<4x24xf32> to vector<4x24x1xf32>
    %53 = vector.broadcast %52 : vector<4x24x1xf32> to vector<4x24x24xf32>
    %54 = arith.subf %50, %53 : vector<4x24x24xf32>
    %55 = math.exp %54 : vector<4x24x24xf32>
    %cst_19 = arith.constant dense<0.000000e+00> : vector<4x24xf32>
    %56 = vector.multi_reduction <add>, %55, %cst_19 [2] : vector<4x24x24xf32> to vector<4x24xf32>
    %57 = vector.shape_cast %56 : vector<4x24xf32> to vector<4x24x1xf32>
    %58 = tpu.reciprocal %57 {approx = true} : vector<4x24x1xf32> -> vector<4x24x1xf32>
    %59 = vector.broadcast %58 : vector<4x24x1xf32> to vector<4x24x24xf32>
    %60 = arith.mulf %55, %59 : vector<4x24x24xf32>
    %61 = vector.extract_strided_slice %2 {offsets = [0, 16], sizes = [96, 16], strides = [1, 1]} : vector<96x48xf32> to vector<96x16xf32>
    %62 = vector.shape_cast %61 : vector<96x16xf32> to vector<4x24x16xf32>
    "tpu.trace_start"() <{level = 10 : i32, message = "gij,gjc->gic"}> : () -> ()
    %cst_20 = arith.constant dense<0.000000e+00> : vector<4x24x16xf32>
    %63 = tpu.matmul %60, %62, %cst_20 {dimension_numbers = #tpu.dot_dimension_numbers<[2], [1], [1], [2], [0, 0, 0, 1, 1, 2], [0], [0]>} : vector<4x24x24xf32>, vector<4x24x16xf32>, vector<4x24x16xf32> -> vector<4x24x16xf32>
    "tpu.trace_stop"() : () -> ()
    %64 = vector.extract_strided_slice %8 {offsets = [0, 0, 2], sizes = [4, 24, 1], strides = [1, 1, 1]} : vector<4x24x3xf32> to vector<4x24x1xf32>
    %65 = tpu.concatenate %64, %13 in 2 : vector<4x24x1xf32>, vector<4x24x1xf32> -> vector<4x24x2xf32>
    %66 = vector.extract_strided_slice %10 {offsets = [0, 0, 2], sizes = [4, 24, 1], strides = [1, 1, 1]} : vector<4x24x3xf32> to vector<4x24x1xf32>
    %67 = tpu.concatenate %13, %66 in 2 : vector<4x24x1xf32>, vector<4x24x1xf32> -> vector<4x24x2xf32>
    "tpu.trace_start"() <{level = 10 : i32, message = "gif,gjf->gij"}> : () -> ()
    %cst_21 = arith.constant dense<0.000000e+00> : vector<4x24x24xf32>
    %68 = tpu.matmul %65, %67, %cst_21 {dimension_numbers = #tpu.dot_dimension_numbers<[2], [2], [1], [1], [0, 0, 0, 1, 1, 1], [0], [0]>} : vector<4x24x2xf32>, vector<4x24x2xf32>, vector<4x24x24xf32> -> vector<4x24x24xf32>
    %cst_22 = arith.constant 0.000000e+00 : f32
    "tpu.trace_stop"() : () -> ()
    %69 = vector.broadcast %cst_22 : f32 to vector<4x24x24xf32>
    %70 = arith.cmpf oge, %68, %69 : vector<4x24x24xf32>
    %cst_23 = arith.constant 2.000000e-01 : f32
    %71 = vector.broadcast %cst_23 : f32 to vector<4x24x24xf32>
    %72 = arith.mulf %71, %68 : vector<4x24x24xf32>
    %73 = arith.select %70, %68, %72 : vector<4x24x24xi1>, vector<4x24x24xf32>
    %74 = vector.broadcast %12 : vector<1x24x24xf32> to vector<4x24x24xf32>
    %75 = arith.addf %73, %74 : vector<4x24x24xf32>
    %cst_24 = arith.constant dense<0xFF800000> : vector<4x24xf32>
    %76 = vector.multi_reduction <maximumf>, %75, %cst_24 [2] : vector<4x24x24xf32> to vector<4x24xf32>
    %77 = vector.shape_cast %76 : vector<4x24xf32> to vector<4x24x1xf32>
    %78 = vector.broadcast %77 : vector<4x24x1xf32> to vector<4x24x24xf32>
    %79 = arith.subf %75, %78 : vector<4x24x24xf32>
    %80 = math.exp %79 : vector<4x24x24xf32>
    %cst_25 = arith.constant dense<0.000000e+00> : vector<4x24xf32>
    %81 = vector.multi_reduction <add>, %80, %cst_25 [2] : vector<4x24x24xf32> to vector<4x24xf32>
    %82 = vector.shape_cast %81 : vector<4x24xf32> to vector<4x24x1xf32>
    %83 = tpu.reciprocal %82 {approx = true} : vector<4x24x1xf32> -> vector<4x24x1xf32>
    %84 = vector.broadcast %83 : vector<4x24x1xf32> to vector<4x24x24xf32>
    %85 = arith.mulf %80, %84 : vector<4x24x24xf32>
    %86 = vector.extract_strided_slice %2 {offsets = [0, 32], sizes = [96, 16], strides = [1, 1]} : vector<96x48xf32> to vector<96x16xf32>
    %87 = vector.shape_cast %86 : vector<96x16xf32> to vector<4x24x16xf32>
    "tpu.trace_start"() <{level = 10 : i32, message = "gij,gjc->gic"}> : () -> ()
    %cst_26 = arith.constant dense<0.000000e+00> : vector<4x24x16xf32>
    %88 = tpu.matmul %85, %87, %cst_26 {dimension_numbers = #tpu.dot_dimension_numbers<[2], [1], [1], [2], [0, 0, 0, 1, 1, 2], [0], [0]>} : vector<4x24x24xf32>, vector<4x24x16xf32>, vector<4x24x16xf32> -> vector<4x24x16xf32>
    "tpu.trace_stop"() : () -> ()
    %89 = tpu.concatenate %38, %63, %88, %6 in 1 : vector<4x24x16xf32>, vector<4x24x16xf32>, vector<4x24x16xf32>, vector<4x24x16xf32> -> vector<4x96x16xf32>
    %c0_27 = arith.constant 0 : index
    %c0_28 = arith.constant 0 : index
    %90 = vector.load %arg5[%c0_27, %c0_28] : memref<21x96xf32, #tpu.memory_space<vmem>>, vector<21x96xf32>
    %91 = vector.shape_cast %90 : vector<21x96xf32> to vector<1x21x96xf32>
    %92 = vector.shape_cast %91 : vector<1x21x96xf32> to vector<1x21x96xf32>
    %93 = vector.broadcast %92 : vector<1x21x96xf32> to vector<4x21x96xf32>
    "tpu.trace_start"() <{level = 10 : i32, message = "gvj,gjc->gvc"}> : () -> ()
    %cst_29 = arith.constant dense<0.000000e+00> : vector<4x21x16xf32>
    %94 = tpu.matmul %93, %89, %cst_29 {dimension_numbers = #tpu.dot_dimension_numbers<[2], [1], [1], [2], [0, 0, 0, 1, 1, 2], [0], [0]>} : vector<4x21x96xf32>, vector<4x96x16xf32>, vector<4x21x16xf32> -> vector<4x21x16xf32>
    "tpu.trace_stop"() : () -> ()
    %c0_30 = arith.constant 0 : index
    %c0_31 = arith.constant 0 : index
    %c0_32 = arith.constant 0 : index
    %95 = vector.load %arg6[%c0_30, %c0_31, %c0_32] : memref<4x21x16xf32, #tpu.memory_space<vmem>>, vector<4x21x16xf32>
    tpu.vector_store %arg6[%c0_30, %c0_31, %c0_32], %94 {strides = array<i32>} : memref<4x21x16xf32, #tpu.memory_space<vmem>>, vector<4x21x16xf32>,
    return
  }
  func.func @transform_0(%arg0: i32) -> (i32, i32) {
    %c0_i32 = arith.constant 0 : i32
    %c0_i32_0 = arith.constant 0 : i32
    return %arg0, %c0_i32 : i32, i32
  }
  func.func @transform_1(%arg0: i32) -> (i32, i32) {
    %c0_i32 = arith.constant 0 : i32
    %c0_i32_0 = arith.constant 0 : i32
    %c0_i32_1 = arith.constant 0 : i32
    return %c0_i32, %c0_i32_0 : i32, i32
  }
  func.func @transform_2(%arg0: i32) -> (i32, i32) {
    %c0_i32 = arith.constant 0 : i32
    %c0_i32_0 = arith.constant 0 : i32
    %c0_i32_1 = arith.constant 0 : i32
    return %c0_i32, %c0_i32_0 : i32, i32
  }
  func.func @transform_3(%arg0: i32) -> (i32, i32) {
    %c0_i32 = arith.constant 0 : i32
    %c0_i32_0 = arith.constant 0 : i32
    %c0_i32_1 = arith.constant 0 : i32
    return %c0_i32, %c0_i32_0 : i32, i32
  }
  func.func @transform_4(%arg0: i32) -> (i32, i32) {
    %c0_i32 = arith.constant 0 : i32
    %c0_i32_0 = arith.constant 0 : i32
    %c0_i32_1 = arith.constant 0 : i32
    return %c0_i32, %c0_i32_0 : i32, i32
  }
  func.func @transform_5(%arg0: i32) -> (i32, i32, i32) {
    %c0_i32 = arith.constant 0 : i32
    %c0_i32_0 = arith.constant 0 : i32
    %c0_i32_1 = arith.constant 0 : i32
    return %arg0, %c0_i32, %c0_i32_0 : i32, i32, i32
  }
}

</mosaic_0001>

<bundles_post_ra>
// kernel: gat_forward.1
= control target key start
LH: loop header
LB: loop body
LE: loop exit
PB: predicated region body
PF: predicated region fallthrough
CT: control target
= control target key end

     0   :  { %s2847_s18 = smov 0   ;;  %s3943_s0 = inlined_call_operand.vmem [shape: f32[384,4], index: 0, kind: input, shape index: {}]   ;;  %s3944_s1 = inlined_call_operand.vmem [shape: f32[4,48], index: 1, kind: input, shape index: {}]   ;;  %s3945_s2 = inlined_call_operand.vmem [shape: f32[4,22], index: 2, kind: input, shape index: {}]   ;;  %s3946_s3 = inlined_call_operand.vmem [shape: f32[24,24], index: 3, kind: input, shape index: {}]   ;;  %s3947_s4 = inlined_call_operand.vmem [shape: f32[21,96], index: 4, kind: input, shape index: {}]   ;;  %s3948_s5 = inlined_call_operand.vmem [shape: f32[16,21,16], index: 5, kind: output, shape index: {}]  }
   0x1 LB: > { %s2425_s19 = sadd.s32 4294967295, %s2809_s18   ;;  %p2429_p0 = scmp.ge.s32.totalorder %s2809_s18, 1  ;;  %s2809_s18 = sphi %s2847_s18, %s15_s18  }
   0x2   : > { %p188_p1 = scmp.lt.s32.totalorder %s2809_s18, 5 }
   0x4   : > { %p189_p2 = pnand %p2429_p0, %p188_p1 }
   0x6   : > { %192 = sbr.rel (%p189_p2) target bundleno = 2358 (0x936), region = 40 }
   0xb   : > { %vm280_vm0 = vcmask 1043456   ;;  %v337_v0 = vld [vmem:[%s3945_s2] sm:$0xf]  ;;  %s217_s22 = smul.u32 12, %s2425_s19  ;;  %vm243_vm1 = vcmask 31744   ;;  %s2811_s27 = smov 110  }
   0xc   : > { %2446 = vmatpush.msk.msra.mxu1 %vm280_vm0, %v337_v0  ;;  %s2812_s28 = smov 112   ;;  %s2813_s29 = smov 109   ;;  %vm506_vm2 = vcmask 15360   ;;  %vm445_vm3 = vcmask 7168   ;;  %v242_v48 = vld [vmem:[%s3944_s1] sm:$0xf] }
   0xd   : > { %p218_p3 = scmp.lt.s32.totalorder %s217_s22, 47  ;;  %s2814_s30 = smov 111   ;;  %2433 = vmatpush.msk.msra.mxu0 %vm280_vm0, %v242_v48  ;;  %vm731_vm5 = vcmask 195584  }
   0xe   : > { %s2815_s14 = smov 108  }
   0xf   : > { %s3973_s22 = smov (!%p218_p3, %s217_s22), 47 }
  0x10   : > { %s2430_s23 = sshll.u32 %s3973_s22, 3 }
  0x11   : > { %s221_s26 = scalar_lea.vmem %s3943_s0, %s2430_s23  ;;  %s2816_s23 = smov 96  }
  0x12   : > { %v2864_v1 = vld [vmem:[%s221_s26] sm:$0xff]  ;;  %v2868_v2 = vld [vmem:[%s221_s26 + $0x8] sm:$0xff]  ;;  %v2872_v3 = vld [vmem:[%s221_s26 + $0x10] sm:$0xff] }
  0x13   : > { %2447 = vmatmul.msk.f32.vlgmr.msra.gmra.mxu1 %vm243_vm1, %v2864_v1  ;;  %v2876_v4 = vld [vmem:[%s221_s26 + $0x18] sm:$0xff]  ;;  %v2880_v5 = vld [vmem:[%s221_s26 + $0x20] sm:$0xff]  ;;  %v2884_v6 = vld [vmem:[%s221_s26 + $0x28] sm:$0xff]  ;;  %2434 = vmatmul.msk.f32.vlgmr.msra.gmra.mxu0 %vm243_vm1, %v2864_v1 }
  0x14   : > { %v2888_v7 = vld [vmem:[%s221_s26 + $0x30] sm:$0xff]  ;;  %v2892_v8 = vld [vmem:[%s221_s26 + $0x38] sm:$0xff]  ;;  %v2896_v9 = vld [vmem:[%s221_s26 + $0x40] sm:$0xff] }
  0x15   : > { %v2900_v10 = vld [vmem:[%s221_s26 + $0x48] sm:$0xff]  ;;  %v2904_v11 = vld [vmem:[%s221_s26 + $0x50] sm:$0xff]  ;;  %v2908_v12 = vld [vmem:[%s221_s26 + $0x58] sm:$0xff] }
  0x1b   : > { %2448 = vmatmul.msk.f32.gmra.mxu1 %vm243_vm1, %v2868_v2  ;;  %2435 = vmatmul.msk.f32.gmra.mxu0 %vm243_vm1, %v2868_v2 }
  0x23   : > { %2449 = vmatmul.msk.f32.gmra.mxu1 %vm243_vm1, %v2872_v3  ;;  %2436 = vmatmul.msk.f32.gmra.mxu0 %vm243_vm1, %v2872_v3 }
  0x2b   : > { %2450 = vmatmul.msk.f32.gmra.mxu1 %vm243_vm1, %v2876_v4  ;;  %2437 = vmatmul.msk.f32.gmra.mxu0 %vm243_vm1, %v2876_v4 }
  0x33   : > { %2451 = vmatmul.msk.f32.gmra.mxu1 %vm243_vm1, %v2880_v5  ;;  %2438 = vmatmul.msk.f32.gmra.mxu0 %vm243_vm1, %v2880_v5 }
  0x3b   : > { %2452 = vmatmul.msk.f32.gmra.mxu1 %vm243_vm1, %v2884_v6  ;;  %2439 = vmatmul.msk.f32.gmra.mxu0 %vm243_vm1, %v2884_v6 }
  0x43   : > { %2453 = vmatmul.msk.f32.gmra.mxu1 %vm243_vm1, %v2888_v7  ;;  %2440 = vmatmul.msk.f32.gmra.mxu0 %vm243_vm1, %v2888_v7 }
  0x4b   : > { %2454 = vmatmul.msk.f32.gmra.mxu1 %vm243_vm1, %v2892_v8  ;;  %2441 = vmatmul.msk.f32.gmra.mxu0 %vm243_vm1, %v2892_v8 }
  0x53   : > { %2455 = vmatmul.msk.f32.gmra.mxu1 %vm243_vm1, %v2896_v9  ;;  %2442 = vmatmul.msk.f32.gmra.mxu0 %vm243_vm1, %v2896_v9 }
  0x5b   : > { %2456 = vmatmul.msk.f32.gmra.mxu1 %vm243_vm1, %v2900_v10  ;;  %2443 = vmatmul.msk.f32.gmra.mxu0 %vm243_vm1, %v2900_v10 }
  0x63   : > { %2457 = vmatmul.msk.f32.gmra.mxu1 %vm243_vm1, %v2904_v11  ;;  %2444 = vmatmul.msk.f32.gmra.mxu0 %vm243_vm1, %v2904_v11 }
  0x6b   : > { %2458 = vmatmul.msk.f32.gmra.mxu1 %vm243_vm1, %v2908_v12  ;;  %2445 = vmatmul.msk.f32.gmra.mxu0 %vm243_vm1, %v2908_v12 }
  0x90   : > { %v2912_v13 = vpop.f32.mrf.mxu1 }
  0x91   : > { %458 = vrot.lane.b32.xlu2 %v2912_v13, %s2811_s27 }
  0x98   : > { %v2916_v14 = vpop.f32.mrf.mxu1 }
  0x99   : > { %460 = vrot.lane.b32.xlu1 %v2916_v14, %s2811_s27 }
  0xa0   : > { %v2920_v15 = vpop.f32.mrf.mxu1 }
  0xa1   : > { %462 = vrot.lane.b32.xlu0 %v2920_v15, %s2811_s27 }
  0xa8   : > { %v2924_v16 = vpop.f32.mrf.mxu1 }
  0xa9   : > { %464 = vrot.lane.b32.xlu2 %v2924_v16, %s2811_s27 }
  0xb0   : > { %v2928_v17 = vpop.f32.mrf.mxu1 }
  0xb1   : > { %411 = vrot.lane.b32.xlu2 %v2916_v14, %s2812_s28  ;;  %466 = vrot.lane.b32.xlu1 %v2928_v17, %s2811_s27 }
  0xb8   : > { %v2934_v18 = vpop.f32.mrf.mxu1 }
  0xb9   : > { %415 = vrot.lane.b32.xlu1 %v2924_v16, %s2812_s28  ;;  %468 = vrot.lane.b32.xlu0 %v2934_v18, %s2811_s27 }
  0xc0   : > { %v2940_v19 = vpop.f32.mrf.mxu1 }
  0xc1   : > { %419 = vrot.lane.b32.xlu1 %v2934_v18, %s2812_s28  ;;  %409 = vrot.lane.b32.xlu0 %v2912_v13, %s2812_s28 }
  0xc8   : > { %v2946_v20 = vpop.f32.mrf.mxu1 }
  0xc9   : > { %417 = vrot.lane.b32.xlu0 %v2928_v17, %s2812_s28  ;;  %472 = vrot.lane.b32.xlu2 %v2946_v20, %s2811_s27 }
  0xd0   : > { %v2952_v21 = vpop.f32.mrf.mxu1 }
  0xd1   : > { %413 = vrot.lane.b32.xlu0 %v2920_v15, %s2812_s28  ;;  %474 = vrot.lane.b32.xlu1 %v2952_v21, %s2811_s27 }
  0xd8   : > { %v2958_v22 = vpop.f32.mrf.mxu1 }
  0xd9   : > { %470 = vrot.lane.b32.xlu1 %v2940_v19, %s2811_s27  ;;  %476 = vrot.lane.b32.xlu2 %v2958_v22, %s2811_s27 }
  0xe0   : > { %v2964_v23 = vpop.f32.mrf.mxu1 }
  0xe1   : > { %427 = vrot.lane.b32.xlu1 %v2958_v22, %s2812_s28  ;;  %423 = vrot.lane.b32.xlu2 %v2946_v20, %s2812_s28 }
  0xe2   : > { %478 = vrot.lane.b32.xlu0 %v2964_v23, %s2811_s27 }
  0xe8   : > { %v2996_v24 = vpop.f32.mrf.mxu1 }
  0xe9   : > { %425 = vrot.lane.b32.xlu1 %v2952_v21, %s2812_s28  ;;  %1068 = vrot.lane.b32.xlu2 %v2952_v21, %s2813_s29 }
  0xea   : > { %421 = vrot.lane.b32.xlu0 %v2940_v19, %s2812_s28 }
  0xeb   : > { %v3004_v25 = vpop.permute.xlu2 %458 }
  0xec   : > { %v494_v31 = vsel %vm445_vm3, 1.0, %v3004_v25 }
  0xf1   : > { %1066 = vrot.lane.b32.xlu1 %v2946_v20, %s2813_s29  ;;  %1064 = vrot.lane.b32.xlu2 %v2940_v19, %s2813_s29 }
  0xf2   : > { %429 = vrot.lane.b32.xlu0 %v2964_v23, %s2812_s28 }
  0xf9   : > { %1070 = vrot.lane.b32.xlu1 %v2958_v22, %s2813_s29  ;;  %1022 = vrot.lane.b32.xlu2 %v2958_v22, %s2814_s30 }
  0xfa   : > { %1016 = vrot.lane.b32.xlu0 %v2940_v19, %s2814_s30 }
 0x101   : > { %1018 = vrot.lane.b32.xlu1 %v2946_v20, %s2814_s30  ;;  %1056 = vrot.lane.b32.xlu2 %v2920_v15, %s2813_s29 }
 0x102   : > { %1072 = vrot.lane.b32.xlu0 %v2964_v23, %s2813_s29 }
 0x103   : > { %v3017_v29 = vpop.permute.xlu2 %464 }
 0x104   : > { %3955 = vst [vmem:[#allocation3_spill] sm:$0xff] %v3017_v29  ;;  %v497_v42 = vsel %vm445_vm3, 1.0, %v3017_v29 }
 0x109   : > { %1062 = vrot.lane.b32.xlu1 %v2934_v18, %s2813_s29  ;;  %480 = vrot.lane.b32.xlu2 %v2996_v24, %s2811_s27 }
 0x10a   : > { %1024 = vrot.lane.b32.xlu0 %v2964_v23, %s2814_s30 }
 0x10b   : > { %v3014_v28 = vpop.permute.xlu1 %460  ;;  %v412_v32 = vpop.permute.xlu2 %411 }
 0x10c   : > { %v495_v30 = vsel %vm445_vm3, 1.0, %v3014_v28  ;;  %v447_v47 = vsel %vm445_vm3, %v412_v32, 1.0 }
 0x111   : > { %431 = vrot.lane.b32.xlu2 %v2996_v24, %s2812_s28 }
 0x112   : > { %1074 = vrot.lane.b32.xlu0 %v2996_v24, %s2813_s29 }
 0x113   : > { %v3010_v26 = vpop.permute.xlu0 %462 }
 0x114   : > { %3954 = vst [vmem:[#allocation2_spill] sm:$0xff] %v3010_v26  ;;  %v496_v27 = vsel %vm445_vm3, 1.0, %v3010_v26 }
 0x115   : > { %2459 = vmatpush.xpose.msk.msra.mxu2 %vm506_vm2, %v496_v27 }
 0x119   : > { %2460 = vmatpush.xpose.msk.msra.mxu2 %vm506_vm2, %v495_v30 }
 0x11d   : > { %2461 = vmatpush.xpose.msk.msra.mxu2 %vm506_vm2, %v494_v31 }
 0x123   : > { %v3025_v33 = vpop.permute.xlu1 %466  ;;  %v3027_v34 = vpop.permute.xlu2 %472 }
 0x124   : > { %3956 = vst [vmem:[#allocation4_spill] sm:$0xff] %v3025_v33  ;;  %v498_v37 = vsel %vm445_vm3, 1.0, %v3025_v33  ;;  %v501_v56 = vsel %vm445_vm3, 1.0, %v3027_v34 }
 0x12b   : > { %v3029_v35 = vpop.permute.xlu0 %468  ;;  %v416_v38 = vpop.permute.xlu1 %415 }
 0x12c   : > { %3957 = vst [vmem:[#allocation5_spill] sm:$0xff] %v3029_v35  ;;  %v499_v36 = vsel %vm445_vm3, 1.0, %v3029_v35  ;;  %v449_v43 = vsel %vm445_vm3, %v416_v38, 1.0 }
 0x12d   : > { %2465 = vmatpush.xpose.msk.msra.mxu3 %vm506_vm2, %v499_v36 }
 0x131   : > { %2466 = vmatpush.xpose.msk.msra.mxu3 %vm506_vm2, %v498_v37 }
 0x133   : > { %v410_v39 = vpop.permute.xlu0 %409  ;;  %v3038_v41 = vpop.permute.xlu2 %476 }
 0x134   : > { %v446_v40 = vsel %vm445_vm3, %v410_v39, 1.0  ;;  %v420_v44 = vpop.permute.xlu1 %419  ;;  %v503_v37 = vsel %vm445_vm3, 1.0, %v3038_v41 }
 0x135   : > { %2462 = vmatmul.msk.f32.vlgmr.msra.gmra.mxu2 %vm506_vm2, %v446_v40  ;;  %2467 = vmatpush.xpose.msk.msra.mxu3 %vm506_vm2, %v497_v42  ;;  %v451_v55 = vsel %vm445_vm3, %v420_v44, 1.0 }
 0x138   : > { %2468 = vmatmul.msk.f32.vlgmr.msra.gmra.mxu3 %vm506_vm2, %v449_v43 }
 0x13b   : > { %v418_v45 = vpop.permute.xlu0 %417  ;;  %v424_v46 = vpop.permute.xlu2 %423 }
 0x13c   : > { %v450_v49 = vsel %vm445_vm3, %v418_v45, 1.0  ;;  %v453_v4 = vsel %vm445_vm3, %v424_v46, 1.0  ;;  %v3139_v46 = vld [vmem:[%s3946_s3] sm:$0xff] }
 0x13d   : > { %2463 = vmatmul.msk.f32.gmra.mxu2 %vm506_vm2, %v447_v47 }
 0x140   : > { %2469 = vmatmul.msk.f32.gmra.mxu3 %vm506_vm2, %v450_v49 }
 0x143   : > { %v414_v50 = vpop.permute.xlu0 %413  ;;  %v3056_v51 = vpop.permute.xlu1 %474 }
 0x144   : > { %v448_v52 = vsel %vm445_vm3, %v414_v50, 1.0  ;;  %v3059_v53 = vpop.permute.xlu2 %1068  ;;  %v502_v54 = vsel %vm445_vm3, 1.0, %v3056_v51 }
 0x145   : > { %2464 = vmatmul.msk.f32.gmra.mxu2 %vm506_vm2, %v448_v52  ;;  %v1096_v26 = vsel %vm445_vm3, 1.0, %v3059_v53 }
 0x146   : > { %2471 = vmatpush.xpose.msk.msrb.mxu2 %vm506_vm2, %v502_v54 }
 0x148   : > { %2470 = vmatmul.msk.f32.gmra.mxu3 %vm506_vm2, %v451_v55  ;;  %v3154_v55 = vld [vmem:[%s3946_s3 + $0x8] sm:$0xff] }
 0x14a   : > { %2472 = vmatpush.xpose.msk.msrb.mxu2 %vm506_vm2, %v501_v56 }
 0x14b   : > { %v3072_v57 = vpop.permute.xlu1 %470 }
 0x14c   : > { %v3074_v58 = vpop.permute.xlu2 %1064  ;;  %v500_v59 = vsel %vm445_vm3, 1.0, %v3072_v57 }
 0x14e   : > { %2473 = vmatpush.xpose.msk.msrb.mxu2 %vm506_vm2, %v500_v59 }
 0x153   : > { %v428_v60 = vpop.permute.xlu1 %427 }
 0x154   : > { %v3081_v61 = vpop.permute.xlu2 %1022  ;;  %v3083_v62 = vpop.permute.xlu0 %478  ;;  %v455_v38 = vsel %vm445_vm3, %v428_v60, 1.0 }
 0x155   : > { %v504_v32 = vsel %vm445_vm3, 1.0, %v3083_v62 }
 0x15b   : > { %v426_v63 = vpop.permute.xlu1 %425 }
 0x15c   : > { %v1057_v0 = vpop.permute.xlu2 %1056  ;;  %v422_v1 = vpop.permute.xlu0 %421  ;;  %v454_v36 = vsel %vm445_vm3, %v426_v63, 1.0 }
 0x15d   : > { %v1090_v2 = vsel %vm445_vm3, 1.0, %v1057_v0  ;;  %v452_v27 = vsel %vm445_vm3, %v422_v1, 1.0 }
 0x15e   : > { %2474 = vmatmul.msk.f32.vlgmr.msrb.gmra.mxu2 %vm506_vm2, %v452_v27  ;;  %2495 = vmatpush.xpose.msk.msrb.mxu0 %vm506_vm2, %v1090_v2 }
 0x163   : > { %v3093_v3 = vpop.permute.xlu1 %1066 }
 0x164   : > { %v3095_v30 = vpop.permute.xlu2 %480  ;;  %v430_v39 = vpop.permute.xlu0 %429 }
 0x165   : > { %3958 = vst [vmem:[#allocation6_spill] sm:$0xff] %v3095_v30  ;;  %v505_v31 = vsel %vm445_vm3, 1.0, %v3095_v30  ;;  %v456_v40 = vsel %vm445_vm3, %v430_v39, 1.0 }
 0x166   : > { %2475 = vmatmul.msk.f32.gmra.mxu2 %vm506_vm2, %v453_v4  ;;  %2477 = vmatpush.xpose.msk.msrb.mxu3 %vm506_vm2, %v505_v31  ;;  %v3164_v4 = vld [vmem:[%s3946_s3 + $0x10] sm:$0xff] }
 0x16a   : > { %2478 = vmatpush.xpose.msk.msrb.mxu3 %vm506_vm2, %v504_v32 }
 0x16b   : > { %v3107_v5 = vpop.permute.xlu1 %1070 }
 0x16c   : > { %v432_v43 = vpop.permute.xlu2 %431 }
 0x16d   : > { %v457_v7 = vsel %vm445_vm3, %v432_v43, 1.0 }
 0x16e   : > { %2476 = vmatmul.msk.f32.gmra.mxu2 %vm506_vm2, %v454_v36  ;;  %2479 = vmatpush.xpose.msk.msrb.mxu3 %vm506_vm2, %v503_v37 }
 0x171   : > { %2480 = vmatmul.msk.f32.vlgmr.msrb.gmra.mxu3 %vm506_vm2, %v455_v38 }
 0x173   : > { %v3118_v6 = vpop.permute.xlu1 %1018 }
 0x179   : > { %2481 = vmatmul.msk.f32.gmra.mxu3 %vm506_vm2, %v456_v40 }
 0x17b   : > { %v1063_v42 = vpop.permute.xlu1 %1062 }
 0x17c   : > { %v1093_v44 = vsel %vm445_vm3, 1.0, %v1063_v42 }
 0x17d   : > { %2501 = vmatpush.xpose.msk.msrb.mxu1 %vm506_vm2, %v1093_v44 }
 0x181   : > { %2482 = vmatmul.msk.f32.gmra.mxu3 %vm506_vm2, %v457_v7 }
 0x1b8   : > { %v542_v8 = vpop.f32.mrf.mxu2 }
 0x1b9   : > { %v695_v45 = vmul.f32 0.2, %v542_v8  ;;  %vm683_vm4 = vcmp.ge.f32.partialorder %v542_v8, 0.0 }
 0x1bb   : > { %v586_v9 = vpop.f32.mrf.mxu3  ;;  %v707_v47 = vsel %vm683_vm4, %v542_v8, %v695_v45 }
 0x1bc   : > { %v698_v48 = vmul.f32 0.2, %v586_v9  ;;  %v3142_v10 = vadd.f32 %v707_v47, %v3139_v46  ;;  %vm686_vm6 = vcmp.ge.f32.partialorder %v586_v9, 0.0 }
 0x1be   : > { %v732_v11 = vsel %vm731_vm5, %v3142_v10, -inf  ;;  %v710_v12 = vsel %vm686_vm6, %v586_v9, %v698_v48 }
 0x1bf   : > { %733 = vmax.xlane.f32.xlu0 %v732_v11  ;;  %v3147_v49 = vadd.f32 %v710_v12, %v3139_v46 }
 0x1c0   : > { %v545_v50 = vpop.f32.mrf.mxu2 }
 0x1c1   : > { %v696_v52 = vmul.f32 0.2, %v545_v50  ;;  %v741_v54 = vsel %vm731_vm5, %v3147_v49, -inf  ;;  %vm684_vm7 = vcmp.ge.f32.partialorder %v545_v50, 0.0 }
 0x1c2   : > { %742 = vmax.xlane.f32.xlu1 %v741_v54 }
 0x1c3   : > { %v589_v56 = vpop.f32.mrf.mxu3  ;;  %v708_v59 = vsel %vm684_vm7, %v545_v50, %v696_v52 }
 0x1c4   : > { %v699_v60 = vmul.f32 0.2, %v589_v56  ;;  %v3157_v63 = vadd.f32 %v708_v59, %v3154_v55  ;;  %vm687_vm8 = vcmp.ge.f32.partialorder %v589_v56, 0.0 }
 0x1c6   : > { %v735_v0 = vsel %vm731_vm5, %v3157_v63, -inf  ;;  %v711_v1 = vsel %vm687_vm8, %v589_v56, %v699_v60 }
 0x1c7   : > { %736 = vmax.xlane.f32.xlu2 %v735_v0  ;;  %v3167_v31 = vadd.f32 %v711_v1, %v3154_v55 }
 0x1c8   : > { %v548_v2 = vpop.f32.mrf.mxu2 }
 0x1c9   : > { %v697_v27 = vmul.f32 0.2, %v548_v2  ;;  %vm685_vm9 = vcmp.ge.f32.partialorder %v548_v2, 0.0  ;;  %v744_v40 = vsel %vm731_vm5, %v3167_v31, -inf }
 0x1cb   : > { %v592_v32 = vpop.f32.mrf.mxu3  ;;  %v709_v36 = vsel %vm685_vm9, %v548_v2, %v697_v27 }
 0x1cc   : > { %v700_v37 = vmul.f32 0.2, %v592_v32  ;;  %v3170_v38 = vadd.f32 %v709_v36, %v3164_v4  ;;  %vm688_vm10 = vcmp.ge.f32.partialorder %v592_v32, 0.0 }
 0x1ce   : > { %v738_v39 = vsel %vm731_vm5, %v3170_v38, -inf  ;;  %v712_v42 = vsel %vm688_vm10, %v592_v32, %v700_v37 }
 0x1cf   : > { %739 = vmax.xlane.f32.xlu0 %v738_v39  ;;  %745 = vmax.xlane.f32.xlu2 %v744_v40  ;;  %v3177_v43 = vadd.f32 %v712_v42, %v3164_v4 }
 0x1d1   : > { %v747_v44 = vsel %vm731_vm5, %v3177_v43, -inf }
 0x1d2   : > { %748 = vmax.xlane.f32.xlu1 %v747_v44 }
 0x1e1   : > { %v630_v7 = vpop.f32.mrf.mxu2 }
 0x1e2   : > { %vm689_vm11 = vcmp.ge.f32.partialorder %v630_v7, 0.0  ;;  %v701_v8 = vmul.f32 0.2, %v630_v7 }
 0x1e4   : > { %v713_v45 = vsel %vm689_vm11, %v630_v7, %v701_v8 }
 0x1e5   : > { %v3182_v9 = vadd.f32 %v713_v45, %v3139_v46 }
 0x1e7   : > { %v750_v47 = vsel %vm731_vm5, %v3182_v9, -inf }
 0x1e8   : > { %751 = vmax.xlane.f32.xlu2 %v750_v47 }
 0x1e9   : > { %v633_v48 = vpop.f32.mrf.mxu2 }
 0x1ea   : > { %vm690_vm12 = vcmp.ge.f32.partialorder %v633_v48, 0.0  ;;  %v702_v11 = vmul.f32 0.2, %v633_v48 }
 0x1ec   : > { %v714_v12 = vsel %vm690_vm12, %v633_v48, %v702_v11  ;;  %v3211_v11 = vpop.permute.xlu0 %1016 }
 0x1ed   : > { %v3187_v50 = vadd.f32 %v714_v12, %v3154_v55 }
 0x1ef   : > { %v753_v52 = vsel %vm731_vm5, %v3187_v50, -inf }
 0x1f0   : > { %754 = vmax.xlane.f32.xlu1 %v753_v52 }
 0x1f1   : > { %v636_v54 = vpop.f32.mrf.mxu2 }
 0x1f2   : > { %vm691_vm13 = vcmp.ge.f32.partialorder %v636_v54, 0.0  ;;  %v703_v56 = vmul.f32 0.2, %v636_v54 }
 0x1f4   : > { %v674_v59 = vpop.f32.mrf.mxu3  ;;  %v715_v60 = vsel %vm691_vm13, %v636_v54, %v703_v56  ;;  %v3213_v12 = vpop.permute.xlu0 %1072 }
 0x1f5   : > { %vm692_vm14 = vcmp.ge.f32.partialorder %v674_v59, 0.0  ;;  %v704_v0 = vmul.f32 0.2, %v674_v59  ;;  %v3192_v1 = vadd.f32 %v715_v60, %v3164_v4 }
 0x1f7   : > { %v756_v2 = vsel %vm731_vm5, %v3192_v1, -inf  ;;  %v716_v27 = vsel %vm692_vm14, %v674_v59, %v704_v0 }
 0x1f8   : > { %757 = vmax.xlane.f32.xlu0 %v756_v2  ;;  %v3197_v32 = vadd.f32 %v716_v27, %v3139_v46 }
 0x1fa   : > { %v759_v39 = vsel %vm731_vm5, %v3197_v32, -inf }
 0x1fc   : > { %v677_v36 = vpop.f32.mrf.mxu3  ;;  %v3215_v52 = vpop.permute.xlu0 %1024 }
 0x1fd   : > { %vm693_vm15 = vcmp.ge.f32.partialorder %v677_v36, 0.0  ;;  %v705_v37 = vmul.f32 0.2, %v677_v36 }
 0x1ff   : > { %v717_v40 = vsel %vm693_vm15, %v677_v36, %v705_v37 }
 0x200   : > { %760 = vmax.xlane.f32.xlu0 %v759_v39  ;;  %v3202_v42 = vadd.f32 %v717_v40, %v3154_v55 }
 0x202   : > { %v762_v44 = vsel %vm731_vm5, %v3202_v42, -inf }
 0x203   : > { %763 = vmax.xlane.f32.xlu2 %v762_v44 }
 0x204   : > { %v680_v7 = vpop.f32.mrf.mxu3  ;;  %v3217_v54 = vpop.permute.xlu0 %1074 }
 0x205   : > { %vm694_vm0 = vcmp.ge.f32.partialorder %v680_v7, 0.0  ;;  %v706_v8 = vmul.f32 0.2, %v680_v7 }
 0x207   : > { %v718_v45 = vsel %vm694_vm0, %v680_v7, %v706_v8 }
 0x208   : > { %v3207_v47 = vadd.f32 %v718_v45, %v3164_v4 }
 0x20a   : > { %v765_v48 = vsel %vm731_vm5, %v3207_v47, -inf }
 0x20b   : > { %766 = vmax.xlane.f32.xlu1 %v765_v48 }
 0x232   : > { %v734_v56 = vpop.xlane.xlu0 %733 }
 0x233   : > { %v768_v59 = vsub.f32 %v3142_v10, %v734_v56 }
 0x235   : > { %v780_v60 = vmul.f32 1.442695, %v768_v59  ;;  %v743_v39 = vpop.xlane.xlu1 %742 }
 0x236   : > { %v771_v10 = vsub.f32 %v3147_v49, %v743_v39  ;;  %v3241_v49 = vpop.f32.mrf.mxu0 }
 0x237   : > { %2656 = vpow2.f32 %v780_v60 }
 0x238   : > { %v786_v45 = vmul.f32 1.442695, %v771_v10 }
 0x23a   : > { %v737_v0 = vpop.xlane.xlu2 %736 }
 0x23b   : > { %v769_v2 = vsub.f32 %v3157_v63, %v737_v0 }
 0x23d   : > { %v3221_v27 = vpop.eup %2656  ;;  %v782_v36 = vmul.f32 1.442695, %v769_v2 }
 0x23e   : > { %v804_v37 = vsel %vm731_vm5, %v3221_v27, 0.0  ;;  %v3243_v60 = vpop.f32.mrf.mxu0 }
 0x23f   : > { %2658 = vpow2.f32 %v782_v36  ;;  %805 = vadd.xlane.f32.xlu2 %v804_v37 }
 0x242   : > { %v740_v40 = vpop.xlane.xlu0 %739  ;;  %v746_v2 = vpop.xlane.xlu2 %745 }
 0x243   : > { %v770_v44 = vsub.f32 %v3170_v38, %v740_v40  ;;  %v772_v36 = vsub.f32 %v3167_v31, %v746_v2 }
 0x245   : > { %v3226_v7 = vpop.eup %2658  ;;  %v784_v8 = vmul.f32 1.442695, %v770_v44  ;;  %v788_v39 = vmul.f32 1.442695, %v772_v36  ;;  %v749_v44 = vpop.xlane.xlu1 %748 }
 0x246   : > { %v807_v63 = vsel %vm731_vm5, %v3226_v7, 0.0  ;;  %v3247_v0 = vpop.f32.mrf.mxu0 }
 0x247   : > { %2660 = vpow2.f32 %v784_v8  ;;  %808 = vadd.xlane.f32.xlu1 %v807_v63  ;;  %886 = vmatpush.msra.mxu2 %v3247_v0  ;;  %v773_v63 = vsub.f32 %v3177_v43, %v749_v44 }
 0x248   : > { %2662 = vpow2.f32 %v786_v45 }
 0x249   : > { %887 = vmatpush.msra.mxu2 %v3243_v60  ;;  %2664 = vpow2.f32 %v788_v39 }
 0x24b   : > { %888 = vmatpush.msra.mxu2 %v3241_v49 }
 0x24d   : > { %v3231_v48 = vpop.eup %2660 }
 0x24e   : > { %v810_v56 = vsel %vm731_vm5, %v3231_v48, 0.0  ;;  %v3235_v59 = vpop.eup %2662  ;;  %v3255_v37 = vpop.f32.mrf.mxu0 }
 0x24f   : > { %811 = vadd.xlane.f32.xlu0 %v810_v56  ;;  %v813_v38 = vsel %vm731_vm5, %v3235_v59, 0.0  ;;  %v3261_v56 = vpop.eup %2664 }
 0x250   : > { %v816_v31 = vsel %vm731_vm5, %v3261_v56, 0.0 }
 0x256   : > { %v3258_v8 = vpop.f32.mrf.mxu0 }
 0x257   : > { %814 = vadd.xlane.f32.xlu0 %v813_v38  ;;  %1026 = vrot.lane.b32.xlu2 %v2996_v24, %s2814_s30  ;;  %v790_v38 = vmul.f32 1.442695, %v773_v63 }
 0x25b   : > { %v752_v40 = vpop.xlane.xlu2 %751 }
 0x25c   : > { %v774_v10 = vsub.f32 %v3182_v9, %v752_v40 }
 0x25e   : > { %v792_v45 = vmul.f32 1.442695, %v774_v10  ;;  %v3265_v2 = vpop.f32.mrf.mxu0 }
 0x25f   : > { %921 = vmatpush.msra.mxu3 %v3265_v2 }
 0x260   : > { %1054 = vrot.lane.b32.xlu1 %v2916_v14, %s2813_s29  ;;  %2666 = vpow2.f32 %v792_v45 }
 0x261   : > { %2668 = vpow2.f32 %v790_v38  ;;  %922 = vmatpush.msra.mxu3 %v3258_v8 }
 0x263   : > { %v755_v35 = vpop.xlane.xlu1 %754  ;;  %923 = vmatpush.msra.mxu3 %v3255_v37 }
 0x264   : > { %v775_v36 = vsub.f32 %v3187_v50, %v755_v35 }
 0x266   : > { %v3271_v9 = vpop.eup %2666  ;;  %v794_v39 = vmul.f32 1.442695, %v775_v36  ;;  %v319_v63 = vpop.f32.mrf.mxu0 }
 0x267   : > { %v3274_v40 = vpop.eup %2668  ;;  %v822_v10 = vsel %vm731_vm5, %v3271_v9, 0.0 }
 0x268   : > { %2670 = vpow2.f32 %v794_v39  ;;  %v819_v50 = vsel %vm731_vm5, %v3274_v40, 0.0 }
 0x26b   : > { %1020 = vrot.lane.b32.xlu0 %v2952_v21, %s2814_s30  ;;  %v758_v33 = vpop.xlane.xlu0 %757 }
 0x26c   : > { %v776_v43 = vsub.f32 %v3192_v1, %v758_v33 }
 0x26e   : > { %v796_v44 = vmul.f32 1.442695, %v776_v43  ;;  %v3281_v1 = vpop.eup %2670  ;;  %v322_v38 = vpop.f32.mrf.mxu0 }
 0x26f   : > { %v825_v36 = vsel %vm731_vm5, %v3281_v1, 0.0 }
 0x270   : > { %2672 = vpow2.f32 %v796_v44 }
 0x273   : > { %v761_v35 = vpop.xlane.xlu0 %760 }
 0x274   : > { %v777_v33 = vsub.f32 %v3197_v32, %v761_v35 }
 0x276   : > { %v798_v45 = vmul.f32 1.442695, %v777_v33  ;;  %v3289_v39 = vpop.f32.mrf.mxu0 }
 0x277   : > { %956 = vmatpush.msrb.mxu2 %v3289_v39 }
 0x278   : > { %2674 = vpow2.f32 %v798_v45  ;;  %v764_v45 = vpop.xlane.xlu2 %763 }
 0x279   : > { %957 = vmatpush.msrb.mxu2 %v322_v38  ;;  %v778_v30 = vsub.f32 %v3202_v42, %v764_v45 }
 0x27b   : > { %958 = vmatpush.msrb.mxu2 %v319_v63 }
 0x280   : > { %817 = vadd.xlane.f32.xlu2 %v816_v31  ;;  %v3283_v31 = vpop.eup %2672 }
 0x281   : > { %v828_v43 = vsel %vm731_vm5, %v3283_v31, 0.0  ;;  %v3292_v32 = vpop.eup %2674 }
 0x282   : > { %v831_v44 = vsel %vm731_vm5, %v3292_v32, 0.0 }
 0x288   : > { %823 = vadd.xlane.f32.xlu2 %v822_v10  ;;  %v328_v10 = vpop.f32.mrf.mxu0 }
 0x289   : > { %v3298_v35 = vpack.i.bf16 %v328_v10, %v319_v63 }
 0x28a   : > { %820 = vadd.xlane.f32.xlu1 %v819_v50 }
 0x290   : > { %v331_v50 = vpop.f32.mrf.mxu0 }
 0x291   : > { %v3302_v33 = vpack.i.bf16 %v331_v50, %v322_v38 }
 0x292   : > { %826 = vadd.xlane.f32.xlu1 %v825_v36 }
 0x295   : > { %829 = vadd.xlane.f32.xlu0 %v828_v43  ;;  %v767_v43 = vpop.xlane.xlu1 %766 }
 0x298   : > { %v3306_v36 = vpop.f32.mrf.mxu0 }
 0x299   : > { %991 = vmatpush.msrb.mxu3 %v3306_v36 }
 0x29b   : > { %992 = vmatpush.msrb.mxu3 %v331_v50 }
 0x29d   : > { %832 = vadd.xlane.f32.xlu0 %v831_v44  ;;  %993 = vmatpush.msrb.mxu3 %v328_v10  ;;  %v1095_v10 = vsel %vm445_vm3, 1.0, %v3093_v3 }
 0x2a0   : > { %1052 = vrot.lane.b32.xlu2 %v2912_v13, %s2813_s29 }
 0x2a8   : > { %1010 = vrot.lane.b32.xlu2 %v2924_v16, %s2814_s30 }
 0x2ab   : > { %1058 = vrot.lane.b32.xlu1 %v2924_v16, %s2813_s29 }
 0x2b1   : > { %1060 = vrot.lane.b32.xlu0 %v2928_v17, %s2813_s29 }
 0x2b2   : > { %v806_v63 = vpop.xlane.xlu2 %805 }
 0x2b3   : > { %2676 = vrcp.f32 %v806_v63  ;;  %v800_v63 = vmul.f32 1.442695, %v778_v30 }
 0x2b9   : > { %v2677_v44 = vpop.eup %2676  ;;  %1004 = vrot.lane.b32.xlu0 %v2912_v13, %s2814_s30 }
 0x2ba   : > { %v852_v38 = vmul.f32 %v2677_v44, %v3221_v27  ;;  %v809_v29 = vpop.xlane.xlu1 %808 }
 0x2bb   : > { %2678 = vrcp.f32 %v809_v29  ;;  %v779_v29 = vsub.f32 %v3207_v47, %v767_v43 }
 0x2bc   : > { %2483 = vmatmul.msk.f32.vlgmr.msra.gmra.mxu2 %vm731_vm5, %v852_v38 }
 0x2bd   : > { %2507 = vmatpush.xpose.msk.msra.mxu2 %vm506_vm2, %v1096_v26  ;;  %v1094_v26 = vsel %vm445_vm3, 1.0, %v3074_v58  ;;  %v802_v3 = vmul.f32 1.442695, %v779_v29  ;;  %v1098_v29 = vsel %vm445_vm3, 1.0, %v3213_v12 }
 0x2c1   : > { %v2679_v50 = vpop.eup %2678  ;;  %2508 = vmatpush.xpose.msk.msra.mxu2 %vm506_vm2, %v1095_v10  ;;  %1012 = vrot.lane.b32.xlu0 %v2928_v17, %s2814_s30 }
 0x2c2   : > { %v812_v27 = vpop.xlane.xlu0 %811  ;;  %v853_v53 = vmul.f32 %v2679_v50, %v3226_v7 }
 0x2c3   : > { %2680 = vrcp.f32 %v812_v27 }
 0x2c4   : > { %2484 = vmatmul.msk.f32.gmra.mxu2 %vm731_vm5, %v853_v53  ;;  %2682 = vpow2.f32 %v800_v63 }
 0x2c5   : > { %2509 = vmatpush.xpose.msk.msra.mxu2 %vm506_vm2, %v1094_v26  ;;  %2684 = vpow2.f32 %v802_v3 }
 0x2c9   : > { %v2681_v42 = vpop.eup %2680 }
 0x2ca   : > { %v815_v45 = vpop.xlane.xlu0 %814  ;;  %v854_v44 = vmul.f32 %v2681_v42, %v3231_v48  ;;  %v3332_v47 = vpop.eup %2682  ;;  %v1099_v48 = vsel %vm445_vm3, 1.0, %v3217_v54 }
 0x2cb   : > { %2686 = vrcp.f32 %v815_v45  ;;  %v3334_v30 = vpop.eup %2684  ;;  %v834_v58 = vsel %vm731_vm5, %v3332_v47, 0.0  ;;  %v3355_v54 = vpop.permute.xlu2 %1026 }
 0x2cc   : > { %2485 = vmatmul.msk.f32.gmra.mxu2 %vm731_vm5, %v854_v44  ;;  %v837_v50 = vsel %vm731_vm5, %v3334_v30, 0.0 }
 0x2d1   : > { %v2687_v7 = vpop.eup %2686  ;;  %835 = vadd.xlane.f32.xlu2 %v834_v58 }
 0x2d2   : > { %v855_v43 = vmul.f32 %v2687_v7, %v3235_v59  ;;  %v1055_v38 = vpop.permute.xlu1 %1054  ;;  %v1097_v59 = vsel %vm445_vm3, 1.0, %v3107_v5 }
 0x2d3   : > { %v1089_v10 = vsel %vm445_vm3, 1.0, %v1055_v38 }
 0x2d4   : > { %2486 = vmatmul.msk.f32.vlgmr.msra.gmra.mxu3 %vm731_vm5, %v855_v43  ;;  %2496 = vmatpush.xpose.msk.msrb.mxu0 %vm506_vm2, %v1089_v10 }
 0x2d5   : > { %2513 = vmatpush.xpose.msk.msra.mxu3 %vm506_vm2, %v1099_v48  ;;  %838 = vadd.xlane.f32.xlu1 %v837_v50 }
 0x2d9   : > { %2514 = vmatpush.xpose.msk.msra.mxu3 %vm506_vm2, %v1098_v29 }
 0x2dd   : > { %2515 = vmatpush.xpose.msk.msra.mxu3 %vm506_vm2, %v1097_v59  ;;  %v1021_v26 = vpop.permute.xlu0 %1020  ;;  %v1046_v59 = vsel %vm445_vm3, %v3211_v11, 1.0 }
 0x2e9   : > { %1008 = vrot.lane.b32.xlu2 %v2920_v15, %s2814_s30 }
 0x2ee   : > { %1006 = vrot.lane.b32.xlu1 %v2916_v14, %s2814_s30 }
 0x2f3   : > { %v818_v27 = vpop.xlane.xlu2 %817 }
 0x2f4   : > { %2688 = vrcp.f32 %v818_v27 }
 0x2f6   : > { %1014 = vrot.lane.b32.xlu1 %v2934_v18, %s2814_s30  ;;  %s2431_s30 = sshll.u32 %s2425_s19, 2 }
 0x2f7   : > { %p224_p4 = scmp.lt.s32.totalorder %s2431_s30, 15 }
 0x2f9   : > { %s3975_s30 = smov (!%p224_p4, %s2431_s30), 15 }
 0x2fa   : > { %v2689_v12 = vpop.eup %2688  ;;  %s2581_s6 = smul.u32 24, %s3975_s30 }
 0x2fb   : > { %v824_v53 = vpop.xlane.xlu2 %823  ;;  %v856_v63 = vmul.f32 %v2689_v12, %v3261_v56 }
 0x2fc   : > { %2690 = vrcp.f32 %v824_v53  ;;  %s228_s9 = scalar_lea.vmem %s3948_s5, %s2581_s6 }
 0x2fd   : > { %v821_v5 = vpop.xlane.xlu1 %820  ;;  %2487 = vmatmul.msk.f32.gmra.mxu3 %vm731_vm5, %v856_v63 }
 0x2fe   : > { %2692 = vrcp.f32 %v821_v5 }
 0x302   : > { %v2691_v3 = vpop.eup %2690 }
 0x303   : > { %v858_v42 = vmul.f32 %v2691_v3, %v3271_v9  ;;  %v1053_v45 = vpop.permute.xlu2 %1052  ;;  %v1048_v3 = vsel %vm445_vm3, %v1021_v26, 1.0  ;;  %v1049_v26 = vsel %vm445_vm3, %v3081_v61, 1.0  ;;  %v1051_v61 = vsel %vm445_vm3, %v3355_v54, 1.0 }
 0x304   : > { %v2693_v44 = vpop.eup %2692  ;;  %v1088_v58 = vsel %vm445_vm3, 1.0, %v1053_v45 }
 0x305   : > { %v827_v7 = vpop.xlane.xlu1 %826  ;;  %2489 = vmatmul.msk.f32.vlgmr.msrb.gmra.mxu2 %vm731_vm5, %v858_v42  ;;  %2497 = vmatpush.xpose.msk.msrb.mxu0 %vm506_vm2, %v1088_v58  ;;  %v857_v56 = vmul.f32 %v2693_v44, %v3274_v40 }
 0x306   : > { %2694 = vrcp.f32 %v827_v7 }
 0x307   : > { %2488 = vmatmul.msk.f32.gmra.mxu3 %vm731_vm5, %v857_v56 }
 0x308   : > { %v830_v43 = vpop.xlane.xlu0 %829 }
 0x309   : > { %2696 = vrcp.f32 %v830_v43 }
 0x30b   : > { %v1011_v53 = vpop.permute.xlu2 %1010 }
 0x30c   : > { %v2695_v38 = vpop.eup %2694  ;;  %v1043_v11 = vsel %vm445_vm3, %v1011_v53, 1.0 }
 0x30d   : > { %v859_v10 = vmul.f32 %v2695_v38, %v3281_v1 }
 0x30f   : > { %2490 = vmatmul.msk.f32.gmra.mxu2 %vm731_vm5, %v859_v10  ;;  %v2697_v48 = vpop.eup %2696 }
 0x310   : > { %v833_v9 = vpop.xlane.xlu0 %832  ;;  %v860_v50 = vmul.f32 %v2697_v48, %v3283_v31  ;;  %v1047_v31 = vsel %vm445_vm3, %v3118_v6, 1.0 }
 0x311   : > { %2698 = vrcp.f32 %v833_v9 }
 0x317   : > { %v2699_v29 = vpop.eup %2698  ;;  %2491 = vmatmul.msk.f32.gmra.mxu2 %vm731_vm5, %v860_v50 }
 0x318   : > { %v861_v40 = vmul.f32 %v2699_v29, %v3292_v32 }
 0x31a   : > { %2492 = vmatmul.msk.f32.vlgmr.msrb.gmra.mxu3 %vm731_vm5, %v861_v40 }
 0x31d   : > { %v1059_v12 = vpop.permute.xlu1 %1058 }
 0x31e   : > { %v1091_v32 = vsel %vm445_vm3, 1.0, %v1059_v12 }
 0x31f   : > { %2510 = vmatmul.msk.f32.vlgmr.msra.gmra.mxu2 %vm506_vm2, %v1046_v59 }
 0x323   : > { %v1061_v1 = vpop.permute.xlu0 %1060 }
 0x324   : > { %v1092_v27 = vsel %vm445_vm3, 1.0, %v1061_v1 }
 0x325   : > { %2502 = vmatpush.xpose.msk.msrb.mxu1 %vm506_vm2, %v1092_v27 }
 0x327   : > { %2511 = vmatmul.msk.f32.gmra.mxu2 %vm506_vm2, %v1047_v31 }
 0x329   : > { %2503 = vmatpush.xpose.msk.msrb.mxu1 %vm506_vm2, %v1091_v32 }
 0x32b   : > { %v1005_v63 = vpop.permute.xlu0 %1004 }
 0x32c   : > { %v1040_v5 = vsel %vm445_vm3, %v1005_v63, 1.0  ;;  %2504 = vmatmul.msk.f32.vlgmr.msrb.gmra.mxu1 %vm506_vm2, %v1043_v11 }
 0x32d   : > { %2498 = vmatmul.msk.f32.vlgmr.msrb.gmra.mxu0 %vm506_vm2, %v1040_v5 }
 0x32f   : > { %2512 = vmatmul.msk.f32.gmra.mxu2 %vm506_vm2, %v1048_v3 }
 0x333   : > { %v1013_v6 = vpop.permute.xlu0 %1012 }
 0x334   : > { %v1044_v42 = vsel %vm445_vm3, %v1013_v6, 1.0 }
 0x335   : > { %2505 = vmatmul.msk.f32.gmra.mxu1 %vm506_vm2, %v1044_v42 }
 0x344   : > { %v836_v45 = vpop.xlane.xlu2 %835 }
 0x345   : > { %2700 = vrcp.f32 %v836_v45 }
 0x348   : > { %v839_v44 = vpop.xlane.xlu1 %838 }
 0x349   : > { %2702 = vrcp.f32 %v839_v44 }
 0x34b   : > { %v2701_v58 = vpop.eup %2700 }
 0x34c   : > { %v862_v7 = vmul.f32 %v2701_v58, %v3332_v47  ;;  %v1050_v47 = vsel %vm445_vm3, %v3215_v52, 1.0  ;;  %v1009_v9 = vpop.permute.xlu2 %1008 }
 0x34e   : > { %2493 = vmatmul.msk.f32.gmra.mxu3 %vm731_vm5, %v862_v7 }
 0x34f   : > { %v2703_v56 = vpop.eup %2702 }
 0x350   : > { %v863_v43 = vmul.f32 %v2703_v56, %v3334_v30  ;;  %v1042_v30 = vsel %vm445_vm3, %v1009_v9, 1.0 }
 0x356   : > { %2494 = vmatmul.msk.f32.gmra.mxu3 %vm731_vm5, %v863_v43 }
 0x35e   : > { %2516 = vmatmul.msk.f32.vlgmr.msra.gmra.mxu3 %vm506_vm2, %v1049_v26 }
 0x360   : > { %v1007_v38 = vpop.permute.xlu1 %1006 }
 0x361   : > { %v1041_v10 = vsel %vm445_vm3, %v1007_v38, 1.0 }
 0x362   : > { %2499 = vmatmul.msk.f32.gmra.mxu0 %vm506_vm2, %v1041_v10 }
 0x366   : > { %2517 = vmatmul.msk.f32.gmra.mxu3 %vm506_vm2, %v1050_v47 }
 0x368   : > { %v1015_v48 = vpop.permute.xlu1 %1014 }
 0x369   : > { %v1045_v50 = vsel %vm445_vm3, %v1015_v48, 1.0 }
 0x36a   : > { %2500 = vmatmul.msk.f32.gmra.mxu0 %vm506_vm2, %v1042_v30  ;;  %2506 = vmatmul.msk.f32.gmra.mxu1 %vm506_vm2, %v1045_v50  ;;  %v3438_v50 = vpop.f32.mrf.mxu2 }
 0x36e   : > { %2518 = vmatmul.msk.f32.gmra.mxu3 %vm506_vm2, %v1051_v61 }
 0x372   : > { %v3440_v61 = vpop.f32.mrf.mxu2 }
 0x3a9   : > { %v1179_v29 = vpop.f32.mrf.mxu1 }
 0x3aa   : > { %vm1279_vm1 = vcmp.ge.f32.partialorder %v1179_v29, 0.0  ;;  %v1291_v52 = vmul.f32 0.2, %v1179_v29  ;;  %v1135_v40 = vpop.f32.mrf.mxu0 }
 0x3ab   : > { %vm1276_vm4 = vcmp.ge.f32.partialorder %v1135_v40, 0.0  ;;  %v1288_v59 = vmul.f32 0.2, %v1135_v40 }
 0x3ac   : > { %v1303_v1 = vsel %vm1279_vm1, %v1179_v29, %v1291_v52  ;;  %v3442_v29 = vpop.f32.mrf.mxu3 }
 0x3ad   : > { %v1315_v27 = vadd.f32 %v1303_v1, %v3139_v46  ;;  %v1300_v12 = vsel %vm1276_vm4, %v1135_v40, %v1288_v59  ;;  %3959 = vst [vmem:[#allocation7_spill] sm:$0xff] %v3442_v29  ;;  %v3446_v40 = vpop.f32.mrf.mxu2  ;;  %v3450_v59 = vpack.i.bf16 %v3306_v36, %v3289_v39  ;;  %v3468_v39 = vpack.i.bf16 %v3258_v8, %v3243_v60 }
 0x3ae   : > { %v1312_v31 = vadd.f32 %v1300_v12, %v3139_v46 }
 0x3af   : > { %v1333_v53 = vsel %vm731_vm5, %v1315_v27, -inf }
 0x3b0   : > { %1334 = vmax.xlane.f32.xlu2 %v1333_v53  ;;  %v1324_v32 = vsel %vm731_vm5, %v1312_v31, -inf }
 0x3b1   : > { %1325 = vmax.xlane.f32.xlu0 %v1324_v32 }
 0x3b2   : > { %v1182_v54 = vpop.f32.mrf.mxu1 }
 0x3b3   : > { %vm1280_vm6 = vcmp.ge.f32.partialorder %v1182_v54, 0.0  ;;  %v1292_v11 = vmul.f32 0.2, %v1182_v54 }
 0x3b4   : > { %v3444_v52 = vpop.f32.mrf.mxu3 }
 0x3b5   : > { %v1304_v63 = vsel %vm1280_vm6, %v1182_v54, %v1292_v11  ;;  %3960 = vst [vmem:[#allocation8_spill] sm:$0xff] %v3444_v52  ;;  %v3458_v12 = vpop.f32.mrf.mxu2 }
 0x3b6   : > { %v3417_v5 = vadd.f32 %v1304_v63, %v3154_v55 }
 0x3b8   : > { %v1336_v3 = vsel %vm731_vm5, %v3417_v5, -inf }
 0x3b9   : > { %1337 = vmax.xlane.f32.xlu0 %v1336_v3 }
 0x3bc   : > { %v3456_v1 = vpop.f32.mrf.mxu3 }
 0x3bd   : > { %3961 = vst [vmem:[#allocation9_spill] sm:$0xff] %v3456_v1  ;;  %v3464_v32 = vpop.f32.mrf.mxu2 }
 0x3c4   : > { %v3462_v53 = vpop.f32.mrf.mxu3 }
 0x3c5   : > { %v3474_v54 = vpop.f32.mrf.mxu2 }
 0x3cd   : > { %2602 = vrot.lane.b32.xlu0 %v3302_v33, %s2812_s28 }
 0x3d1   : > { %v3472_v36 = vpop.f32.mrf.mxu3 }
 0x3d9   : > { %v3476_v63 = vpop.f32.mrf.mxu3 }
 0x3df   : > { %v1138_v6 = vpop.f32.mrf.mxu0 }
 0x3e0   : > { %vm1277_vm7 = vcmp.ge.f32.partialorder %v1138_v6, 0.0  ;;  %v1289_v42 = vmul.f32 0.2, %v1138_v6 }
 0x3e1   : > { %v1267_v8 = vpop.f32.mrf.mxu3 }
 0x3e2   : > { %v1301_v45 = vsel %vm1277_vm7, %v1138_v6, %v1289_v42  ;;  %vm1285_vm15 = vcmp.ge.f32.partialorder %v1267_v8, 0.0 }
 0x3e3   : > { %v3424_v44 = vadd.f32 %v1301_v45, %v3154_v55 }
 0x3e5   : > { %v1327_v58 = vsel %vm731_vm5, %v3424_v44, -inf }
 0x3e6   : > { %1328 = vmax.xlane.f32.xlu1 %v1327_v58 }
 0x3e7   : > { %v1141_v7 = vpop.f32.mrf.mxu0  ;;  %v1185_v56 = vpop.f32.mrf.mxu1 }
 0x3e8   : > { %vm1278_vm8 = vcmp.ge.f32.partialorder %v1141_v7, 0.0  ;;  %v1290_v43 = vmul.f32 0.2, %v1141_v7  ;;  %vm1281_vm9 = vcmp.ge.f32.partialorder %v1185_v56, 0.0  ;;  %v1293_v26 = vmul.f32 0.2, %v1185_v56 }
 0x3ea   : > { %v1305_v38 = vsel %vm1281_vm9, %v1185_v56, %v1293_v26  ;;  %v1302_v10 = vsel %vm1278_vm8, %v1141_v7, %v1290_v43  ;;  %v1223_v7 = vpop.f32.mrf.mxu2 }
 0x3eb   : > { %v3429_v47 = vadd.f32 %v1305_v38, %v3164_v4  ;;  %v3432_v9 = vadd.f32 %v1302_v10, %v3164_v4  ;;  %vm1282_vm12 = vcmp.ge.f32.partialorder %v1223_v7, 0.0 }
 0x3ed   : > { %v1339_v48 = vsel %vm731_vm5, %v3429_v47, -inf  ;;  %v1330_v30 = vsel %vm731_vm5, %v3432_v9, -inf }
 0x3ee   : > { %1340 = vmax.xlane.f32.xlu1 %v1339_v48  ;;  %1331 = vmax.xlane.f32.xlu2 %v1330_v30  ;;  %v1270_v48 = vpop.f32.mrf.mxu3 }
 0x3ef   : > { %vm1286_vm14 = vcmp.ge.f32.partialorder %v1270_v48, 0.0 }
 0x406   : > { %2607 = vrot.lane.b32.xlu2 %v3298_v35, %s2812_s28 }
 0x407   : > { %2597 = vrot.lane.b32.xlu1 %v3450_v59, %s2812_s28 }
 0x40f   : > { %1672 = vrot.lane.b32.xlu1 %v2952_v21, %s2815_s14 }
 0x417   : > { %2617 = vrot.lane.b32.xlu1 %v3468_v39, %s2812_s28 }
 0x423   : > { %v1335_v11 = vpop.xlane.xlu2 %1334 }
 0x424   : > { %v1363_v3 = vsub.f32 %v1315_v27, %v1335_v11  ;;  %v1326_v6 = vpop.xlane.xlu0 %1325  ;;  %v1226_v27 = vpop.f32.mrf.mxu2 }
 0x425   : > { %v1360_v42 = vsub.f32 %v1312_v31, %v1326_v6  ;;  %v1295_v38 = vmul.f32 0.2, %v1226_v27  ;;  %vm1283_vm10 = vcmp.ge.f32.partialorder %v1226_v27, 0.0 }
 0x426   : > { %v1378_v45 = vmul.f32 1.442695, %v1363_v3 }
 0x427   : > { %v1372_v58 = vmul.f32 1.442695, %v1360_v42  ;;  %v1307_v30 = vsel %vm1283_vm10, %v1226_v27, %v1295_v38  ;;  %v1273_v42 = vpop.f32.mrf.mxu3 }
 0x428   : > { %2704 = vpow2.f32 %v1378_v45  ;;  %v3488_v3 = vadd.f32 %v1307_v30, %v3154_v55  ;;  %vm1287_vm11 = vcmp.ge.f32.partialorder %v1273_v42, 0.0 }
 0x429   : > { %2706 = vpow2.f32 %v1372_v58  ;;  %v1299_v58 = vmul.f32 0.2, %v1273_v42 }
 0x42a   : > { %v1345_v6 = vsel %vm731_vm5, %v3488_v3, -inf }
 0x42c   : > { %v1338_v31 = vpop.xlane.xlu0 %1337 }
 0x42d   : > { %v1364_v10 = vsub.f32 %v3417_v5, %v1338_v31  ;;  %v3498_v5 = vpack.i.bf16 %v3265_v2, %v3247_v0  ;;  %v1229_v2 = vpop.f32.mrf.mxu2 }
 0x42e   : > { %v3478_v60 = vpop.eup %2704  ;;  %vm1284_vm13 = vcmp.ge.f32.partialorder %v1229_v2, 0.0 }
 0x42f   : > { %v3480_v56 = vpop.eup %2706  ;;  %v1405_v43 = vsel %vm731_vm5, %v3478_v60, 0.0  ;;  %v1380_v11 = vmul.f32 1.442695, %v1364_v10  ;;  %v1294_v10 = vmul.f32 0.2, %v1223_v7 }
 0x430   : > { %1406 = vadd.xlane.f32.xlu0 %v1405_v43  ;;  %v1396_v26 = vsel %vm731_vm5, %v3480_v56, 0.0 }
 0x431   : > { %1397 = vadd.xlane.f32.xlu2 %v1396_v26  ;;  %2708 = vpow2.f32 %v1380_v11  ;;  %v1311_v26 = vsel %vm1287_vm11, %v1273_v42, %v1299_v58  ;;  %v1296_v11 = vmul.f32 0.2, %v1229_v2  ;;  %v1298_v58 = vmul.f32 0.2, %v1270_v48 }
 0x432   : > { %v3505_v27 = vadd.f32 %v1311_v26, %v3164_v4 }
 0x433   : > { %v1308_v26 = vsel %vm1284_vm13, %v1229_v2, %v1296_v11  ;;  %vm2353_vm13 = vcmask 130048  }
 0x434   : > { %v1357_v31 = vsel %vm731_vm5, %v3505_v27, -inf }
 0x437   : > { %v3494_v45 = vpop.eup %2708 }
 0x438   : > { %v1408_v43 = vsel %vm731_vm5, %v3494_v45, 0.0 }
 0x441   : > { %1346 = vmax.xlane.f32.xlu1 %v1345_v6  ;;  %v1306_v6 = vsel %vm1282_vm12, %v1223_v7, %v1294_v10  ;;  %v1297_v7 = vmul.f32 0.2, %v1267_v8 }
 0x442   : > { %v3511_v42 = vadd.f32 %v1306_v6, %v3139_v46 }
 0x444   : > { %1678 = vrot.lane.b32.xlu0 %v2996_v24, %s2815_s14 }
 0x449   : > { %1409 = vadd.xlane.f32.xlu1 %v1408_v43  ;;  %2612 = vrot.lane.b32.xlu2 %v3498_v5, %s2812_s28 }
 0x451   : > { %1358 = vmax.xlane.f32.xlu1 %v1357_v31 }
 0x459   : > { %v1329_v43 = vpop.xlane.xlu1 %1328 }
 0x45a   : > { %v1361_v31 = vsub.f32 %v3424_v44, %v1329_v43 }
 0x45c   : > { %v1374_v2 = vmul.f32 1.442695, %v1361_v31 }
 0x461   : > { %v1332_v38 = vpop.xlane.xlu2 %1331 }
 0x462   : > { %v1362_v0 = vsub.f32 %v3432_v9, %v1332_v38  ;;  %v1342_v9 = vsel %vm731_vm5, %v3511_v42, -inf  ;;  %v3519_v38 = vadd.f32 %v1308_v26, %v3164_v4  ;;  %v1309_v4 = vsel %vm1285_vm15, %v1267_v8, %v1297_v7 }
 0x463   : > { %v3533_v43 = vadd.f32 %v1309_v4, %v3139_v46 }
 0x464   : > { %v1376_v30 = vmul.f32 1.442695, %v1362_v0  ;;  %v1310_v0 = vsel %vm1286_vm14, %v1270_v48, %v1298_v58  ;;  %v1348_v44 = vsel %vm731_vm5, %v3519_v38, -inf  ;;  %v2603_v48 = vpop.permute.xlu0 %2602  ;;  %vm2356_vm14 = vcmask 126976  }
 0x465   : > { %v3528_v11 = vadd.f32 %v1310_v0, %v3154_v55  ;;  %v1351_v26 = vsel %vm731_vm5, %v3533_v43, -inf  ;;  %v2605_v8 = vunpack.i.h.bf16 %v2603_v48  ;;  %v2604_v7 = vunpack.i.l.bf16 %v2603_v48 }
 0x466   : > { %2710 = vpow2.f32 %v1376_v30  ;;  %v3523_v30 = vpop.xlane.xlu1 %1340 }
 0x467   : > { %2712 = vpow2.f32 %v1374_v2  ;;  %v1354_v6 = vsel %vm731_vm5, %v3528_v11, -inf }
 0x46c   : > { %v3513_v29 = vpop.eup %2710 }
 0x46d   : > { %v1402_v10 = vsel %vm731_vm5, %v3513_v29, 0.0  ;;  %v3537_v55 = vpop.eup %2712 }
 0x46e   : > { %1343 = vmax.xlane.f32.xlu0 %v1342_v9  ;;  %1403 = vadd.xlane.f32.xlu1 %v1402_v10  ;;  %v2608_v10 = vpop.permute.xlu2 %2607  ;;  %v1399_v46 = vsel %vm731_vm5, %v3537_v55, 0.0 }
 0x46f   : > { %v2610_v0 = vunpack.i.h.bf16 %v2608_v10  ;;  %v2609_v2 = vunpack.i.l.bf16 %v2608_v10 }
 0x472   : > { %1349 = vmax.xlane.f32.xlu2 %v1348_v44 }
 0x476   : > { %1355 = vmax.xlane.f32.xlu0 %v1354_v6  ;;  %v3551_v6 = vpack.i.bf16 %v3255_v37, %v3241_v49 }
 0x479   : > { %v2598_v58 = vpop.permute.xlu1 %2597 }
 0x47a   : > { %v2600_v31 = vunpack.i.h.bf16 %v2598_v58  ;;  %v2599_v9 = vunpack.i.l.bf16 %v2598_v58  ;;  %1352 = vmax.xlane.f32.xlu2 %v1351_v26 }
 0x47c   : > { %1584 = vmatpush.msrb.mxu2 %v2599_v9  ;;  %1631 = vmatpush.msrb.mxu3 %v2600_v31 }
 0x47e   : > { %1585 = vmatpush.msrb.mxu2 %v2604_v7  ;;  %1632 = vmatpush.msrb.mxu3 %v2605_v8 }
 0x47f   : > { %1400 = vadd.xlane.f32.xlu0 %v1399_v46 }
 0x480   : > { %1586 = vmatpush.msrb.mxu2 %v2609_v2  ;;  %1633 = vmatpush.msrb.mxu3 %v2610_v0 }
 0x481   : > { %v1673_v44 = vpop.permute.xlu1 %1672 }
 0x482   : > { %v1700_v4 = vsel %vm445_vm3, 1.0, %v1673_v44 }
 0x483   : > { %2543 = vmatpush.xpose.msk.msra.mxu2 %vm506_vm2, %v1700_v4 }
 0x487   : > { %1660 = vrot.lane.b32.xlu1 %v2920_v15, %s2815_s14 }
 0x489   : > { %v2618_v58 = vpop.permute.xlu1 %2617 }
 0x48a   : > { %v2620_v8 = vunpack.i.h.bf16 %v2618_v58  ;;  %v2619_v7 = vunpack.i.l.bf16 %v2618_v58 }
 0x492   : > { %1670 = vrot.lane.b32.xlu2 %v2946_v20, %s2815_s14 }
 0x49a   : > { %1676 = vrot.lane.b32.xlu2 %v2964_v23, %s2815_s14 }
 0x4a2   : > { %2622 = vrot.lane.b32.xlu2 %v3551_v6, %s2812_s28 }
 0x4a3   : > { %v1407_v10 = vpop.xlane.xlu0 %1406 }
 0x4a4   : > { %v1398_v48 = vpop.xlane.xlu2 %1397 }
 0x4ac   : > { %v2613_v26 = vpop.permute.xlu2 %2612 }
 0x4ad   : > { %v2615_v31 = vunpack.i.h.bf16 %v2613_v26  ;;  %v2614_v9 = vunpack.i.l.bf16 %v2613_v26 }
 0x4af   : > { %1490 = vmatpush.msra.mxu0 %v2614_v9  ;;  %1537 = vmatpush.msra.mxu1 %v2615_v31 }
 0x4b1   : > { %1491 = vmatpush.msra.mxu0 %v2619_v7  ;;  %1538 = vmatpush.msra.mxu1 %v2620_v8 }
 0x4b4   : > { %v1347_v0 = vpop.xlane.xlu1 %1346 }
 0x4b5   : > { %v1367_v37 = vsub.f32 %v3488_v3, %v1347_v0 }
 0x4b6   : > { %v1679_v2 = vpop.permute.xlu0 %1678 }
 0x4b7   : > { %v1703_v49 = vsel %vm445_vm3, 1.0, %v1679_v2  ;;  %v1386_v44 = vmul.f32 1.442695, %v1367_v37 }
 0x4b8   : > { %2549 = vmatpush.xpose.msk.msra.mxu3 %vm506_vm2, %v1703_v49 }
 0x4b9   : > { %2714 = vpow2.f32 %v1386_v44 }
 0x4bc   : > { %v1410_v46 = vpop.xlane.xlu1 %1409 }
 0x4bf   : > { %v3559_v52 = vpop.eup %2714 }
 0x4c0   : > { %v1417_v31 = vsel %vm731_vm5, %v3559_v52, 0.0 }
 0x4c4   : > { %v1359_v4 = vpop.xlane.xlu1 %1358 }
 0x4c5   : > { %v1371_v26 = vsub.f32 %v3505_v27, %v1359_v4 }
 0x4c7   : > { %v1394_v58 = vmul.f32 1.442695, %v1371_v26 }
 0x4c9   : > { %2716 = vpow2.f32 %v1394_v58 }
 0x4cb   : > { %1418 = vadd.xlane.f32.xlu2 %v1417_v31 }
 0x4cf   : > { %v3563_v9 = vpop.eup %2716 }
 0x4d0   : > { %v1429_v8 = vsel %vm731_vm5, %v3563_v9, 0.0 }
 0x4d1   : > { %1430 = vadd.xlane.f32.xlu1 %v1429_v8 }
 0x4e1   : > { %v1344_v3 = vpop.xlane.xlu0 %1343 }
 0x4e2   : > { %v1366_v7 = vsub.f32 %v3511_v42, %v1344_v3 }
 0x4e4   : > { %v1384_v0 = vmul.f32 1.442695, %v1366_v7 }
 0x4e5   : > { %v1350_v2 = vpop.xlane.xlu2 %1349 }
 0x4e6   : > { %2718 = vpow2.f32 %v1384_v0  ;;  %v1368_v27 = vsub.f32 %v3519_v38, %v1350_v2 }
 0x4e8   : > { %v1388_v49 = vmul.f32 1.442695, %v1368_v27 }
 0x4e9   : > { %v1356_v44 = vpop.xlane.xlu0 %1355 }
 0x4ea   : > { %1656 = vrot.lane.b32.xlu1 %v2912_v13, %s2815_s14  ;;  %2720 = vpow2.f32 %v1388_v49  ;;  %v1370_v42 = vsub.f32 %v3528_v11, %v1356_v44  ;;  %v1404_v49 = vpop.xlane.xlu1 %1403 }
 0x4ec   : > { %v3571_v37 = vpop.eup %2718  ;;  %v1392_v38 = vmul.f32 1.442695, %v1370_v42 }
 0x4ed   : > { %v1353_v4 = vpop.xlane.xlu2 %1352  ;;  %v1414_v26 = vsel %vm731_vm5, %v3571_v37, 0.0 }
 0x4ee   : > { %v1369_v58 = vsub.f32 %v3533_v43, %v1353_v4  ;;  %1415 = vadd.xlane.f32.xlu0 %v1414_v26 }
 0x4f0   : > { %v1390_v31 = vmul.f32 1.442695, %v1369_v58  ;;  %v3577_v8 = vpop.eup %2720 }
 0x4f1   : > { %v1420_v7 = vsel %vm731_vm5, %v3577_v8, 0.0 }
 0x4f2   : > { %2722 = vpow2.f32 %v1390_v31  ;;  %v1401_v58 = vpop.xlane.xlu0 %1400 }
 0x4f3   : > { %2724 = vpow2.f32 %v1392_v38 }
 0x4f4   : > { %2726 = vrcp.f32 %v1407_v10 }
 0x4f5   : > { %v1671_v3 = vpop.permute.xlu2 %1670  ;;  %2728 = vrcp.f32 %v1398_v48 }
 0x4f6   : > { %v1699_v0 = vsel %vm445_vm3, 1.0, %v1671_v3  ;;  %1421 = vadd.xlane.f32.xlu0 %v1420_v7  ;;  %2730 = vrcp.f32 %v1410_v46 }
 0x4f7   : > { %2544 = vmatpush.xpose.msk.msra.mxu2 %vm506_vm2, %v1699_v0  ;;  %2732 = vrcp.f32 %v1401_v58 }
 0x4f8   : > { %v3583_v2 = vpop.eup %2722  ;;  %2734 = vrcp.f32 %v1404_v49 }
 0x4f9   : > { %v1423_v11 = vsel %vm731_vm5, %v3583_v2, 0.0  ;;  %v3587_v27 = vpop.eup %2724  ;;  %v1661_v10 = vpop.permute.xlu1 %1660 }
 0x4fa   : > { %1424 = vadd.xlane.f32.xlu2 %v1423_v11  ;;  %v1426_v4 = vsel %vm731_vm5, %v3587_v27, 0.0  ;;  %v2727_v26 = vpop.eup %2726  ;;  %v1694_v0 = vsel %vm445_vm3, 1.0, %v1661_v10 }
 0x4fb   : > { %v2729_v42 = vpop.eup %2728  ;;  %v1447_v48 = vmul.f32 %v2727_v26, %v3478_v60 }
 0x4fc   : > { %v1444_v7 = vmul.f32 %v2729_v42, %v3480_v56  ;;  %v2731_v46 = vpop.eup %2730 }
 0x4fd   : > { %v1677_v43 = vpop.permute.xlu2 %1676  ;;  %v2733_v11 = vpop.eup %2732  ;;  %v1448_v56 = vmul.f32 %v2731_v46, %v3494_v45  ;;  %v1365_v45 = vsub.f32 %v3429_v47, %v3523_v30 }
 0x4fe   : > { %v1702_v44 = vsel %vm445_vm3, 1.0, %v1677_v43  ;;  %v1445_v60 = vmul.f32 %v2733_v11, %v3537_v55  ;;  %v2735_v43 = vpop.eup %2734 }
 0x4ff   : > { %2550 = vmatpush.xpose.msk.msra.mxu3 %vm506_vm2, %v1702_v44  ;;  %v1446_v44 = vmul.f32 %v2735_v43, %v3513_v29  ;;  %v1382_v55 = vmul.f32 1.442695, %v1365_v45 }
 0x501   : > { %2736 = vpow2.f32 %v1382_v55 }
 0x502   : > { %1427 = vadd.xlane.f32.xlu2 %v1426_v4 }
 0x505   : > { %v2623_v31 = vpop.permute.xlu2 %2622 }
 0x506   : > { %v2625_v38 = vunpack.i.h.bf16 %v2623_v31  ;;  %v2624_v3 = vunpack.i.l.bf16 %v2623_v31 }
 0x507   : > { %v3619_v29 = vpop.eup %2736 }
 0x508   : > { %1492 = vmatpush.msra.mxu0 %v2624_v3  ;;  %1539 = vmatpush.msra.mxu1 %v2625_v38  ;;  %v1411_v49 = vsel %vm731_vm5, %v3619_v29, 0.0 }
 0x509   : > { %2519 = vmatmul.msk.f32.vlgmr.msra.gmra.mxu0 %vm731_vm5, %v1444_v7  ;;  %2522 = vmatmul.msk.f32.vlgmr.msra.gmra.mxu1 %vm731_vm5, %v1447_v48 }
 0x50a   : > { %2531 = vmatpush.xpose.msk.msrb.mxu0 %vm506_vm2, %v1694_v0  ;;  %1674 = vrot.lane.b32.xlu0 %v2958_v22, %s2815_s14 }
 0x511   : > { %2520 = vmatmul.msk.f32.gmra.mxu0 %vm731_vm5, %v1445_v60  ;;  %2523 = vmatmul.msk.f32.gmra.mxu1 %vm731_vm5, %v1448_v56 }
 0x512   : > { %1666 = vrot.lane.b32.xlu0 %v2934_v18, %s2815_s14 }
 0x519   : > { %2521 = vmatmul.msk.f32.gmra.mxu0 %vm731_vm5, %v1446_v44 }
 0x51a   : > { %1658 = vrot.lane.b32.xlu0 %v2916_v14, %s2815_s14  ;;  %1668 = vrot.lane.b32.xlu2 %v2940_v19, %s2815_s14 }
 0x522   : > { %1664 = vrot.lane.b32.xlu0 %v2928_v17, %s2815_s14 }
 0x52a   : > { %1662 = vrot.lane.b32.xlu0 %v2924_v16, %s2815_s14 }
 0x53e   : > { %v1419_v26 = vpop.xlane.xlu2 %1418 }
 0x543   : > { %1412 = vadd.xlane.f32.xlu2 %v1411_v49 }
 0x561   : > { %v1416_v4 = vpop.xlane.xlu0 %1415 }
 0x562   : > { %2738 = vrcp.f32 %v1416_v4 }
 0x563   : > { %2740 = vrcp.f32 %v1419_v26 }
 0x568   : > { %v2739_v58 = vpop.eup %2738 }
 0x569   : > { %v1450_v42 = vmul.f32 %v2739_v58, %v3571_v37  ;;  %v1422_v31 = vpop.xlane.xlu0 %1421  ;;  %v2741_v47 = vpop.eup %2740  ;;  %v1644_v58 = vsel %vm445_vm3, %v3004_v25, 1.0  ;;  %v3962_v25 = vld [vmem:[#allocation6_spill] sm:$0xff] }
 0x56a   : > { %v1451_v30 = vmul.f32 %v2741_v47, %v3559_v52  ;;  %v1431_v37 = vpop.xlane.xlu1 %1430 }
 0x56b   : > { %2525 = vmatmul.msk.f32.vlgmr.msrb.gmra.mxu2 %vm731_vm5, %v1450_v42 }
 0x56d   : > { %v1425_v10 = vpop.xlane.xlu2 %1424 }
 0x56e   : > { %2742 = vrcp.f32 %v1425_v10 }
 0x56f   : > { %2744 = vrcp.f32 %v1422_v31  ;;  %v1654_v31 = vsel %vm445_vm3, %v3083_v62, 1.0 }
 0x572   : > { %v1657_v26 = vpop.permute.xlu1 %1656 }
 0x573   : > { %2526 = vmatmul.msk.f32.gmra.mxu2 %vm731_vm5, %v1451_v30  ;;  %v1655_v30 = vsel %vm445_vm3, %v3962_v25, 1.0 }
 0x574   : > { %v2743_v38 = vpop.eup %2742 }
 0x575   : > { %v1453_v3 = vmul.f32 %v2743_v38, %v3583_v2  ;;  %v1428_v48 = vpop.xlane.xlu2 %1427  ;;  %v2745_v7 = vpop.eup %2744  ;;  %v3963_v38 = vld [vmem:[#allocation2_spill] sm:$0xff] }
 0x576   : > { %2746 = vrcp.f32 %v1428_v48  ;;  %v1452_v0 = vmul.f32 %v2745_v7, %v3577_v8  ;;  %v1650_v8 = vsel %vm445_vm3, %v3072_v57, 1.0  ;;  %v1653_v57 = vsel %vm445_vm3, %v3038_v41, 1.0  ;;  %v3964_v7 = vld [vmem:[#allocation3_spill] sm:$0xff] }
 0x577   : > { %2528 = vmatmul.msk.f32.vlgmr.msrb.gmra.mxu3 %vm731_vm5, %v1453_v3  ;;  %2748 = vrcp.f32 %v1431_v37  ;;  %v1646_v62 = vsel %vm445_vm3, %v3963_v38, 1.0  ;;  %v1647_v37 = vsel %vm445_vm3, %v3964_v7, 1.0 }
 0x57b   : > { %2527 = vmatmul.msk.f32.gmra.mxu2 %vm731_vm5, %v1452_v0  ;;  %v3965_v0 = vld [vmem:[#allocation4_spill] sm:$0xff] }
 0x57c   : > { %v2747_v46 = vpop.eup %2746  ;;  %v1675_v11 = vpop.permute.xlu0 %1674 }
 0x57d   : > { %v1701_v52 = vsel %vm445_vm3, 1.0, %v1675_v11  ;;  %v1669_v60 = vpop.permute.xlu2 %1668  ;;  %v1454_v56 = vmul.f32 %v2747_v46, %v3587_v27  ;;  %v2749_v43 = vpop.eup %2748  ;;  %v1651_v27 = vsel %vm445_vm3, %v3027_v34, 1.0  ;;  %v1652_v34 = vsel %vm445_vm3, %v3056_v51, 1.0  ;;  %v3966_v11 = vld [vmem:[#allocation5_spill] sm:$0xff] }
 0x57e   : > { %v1698_v2 = vsel %vm445_vm3, 1.0, %v1669_v60  ;;  %2551 = vmatpush.xpose.msk.msra.mxu3 %vm506_vm2, %v1701_v52  ;;  %v1455_v55 = vmul.f32 %v2749_v43, %v3563_v9  ;;  %v1692_v9 = vsel %vm445_vm3, 1.0, %v1657_v26  ;;  %v1645_v51 = vsel %vm445_vm3, %v3014_v28, 1.0  ;;  %v3708_v26 = vld [vmem:[%s3946_s3 + $0x8] sm:$0xff] }
 0x57f   : > { %2529 = vmatmul.msk.f32.gmra.mxu3 %vm731_vm5, %v1454_v56  ;;  %2545 = vmatpush.xpose.msk.msra.mxu2 %vm506_vm2, %v1698_v2  ;;  %v1648_v46 = vsel %vm445_vm3, %v3965_v0, 1.0  ;;  %v1649_v52 = vsel %vm445_vm3, %v3966_v11, 1.0 }
 0x583   : > { %2546 = vmatmul.msk.f32.vlgmr.msra.gmra.mxu2 %vm506_vm2, %v1650_v8 }
 0x584   : > { %v1667_v44 = vpop.permute.xlu0 %1666 }
 0x585   : > { %v1697_v45 = vsel %vm445_vm3, 1.0, %v1667_v44  ;;  %v3696_v44 = vld [vmem:[%s3946_s3] sm:$0xff] }
 0x586   : > { %2537 = vmatpush.xpose.msk.msrb.mxu1 %vm506_vm2, %v1697_v45  ;;  %v3687_v60 = vpop.f32.mrf.mxu0 }
 0x587   : > { %2530 = vmatmul.msk.f32.gmra.mxu3 %vm731_vm5, %v1455_v55 }
 0x58b   : > { %2547 = vmatmul.msk.f32.gmra.mxu2 %vm506_vm2, %v1651_v27 }
 0x58c   : > { %v1659_v49 = vpop.permute.xlu0 %1658 }
 0x58d   : > { %v1693_v4 = vsel %vm445_vm3, 1.0, %v1659_v49 }
 0x58e   : > { %2532 = vmatpush.xpose.msk.msrb.mxu0 %vm506_vm2, %v1693_v4 }
 0x58f   : > { %2552 = vmatmul.msk.f32.vlgmr.msra.gmra.mxu3 %vm506_vm2, %v1653_v57 }
 0x592   : > { %2533 = vmatpush.xpose.msk.msrb.mxu0 %vm506_vm2, %v1692_v9 }
 0x593   : > { %2548 = vmatmul.msk.f32.gmra.mxu2 %vm506_vm2, %v1652_v34 }
 0x594   : > { %v1665_v42 = vpop.permute.xlu0 %1664 }
 0x595   : > { %v1696_v41 = vsel %vm445_vm3, 1.0, %v1665_v42  ;;  %2534 = vmatmul.msk.f32.vlgmr.msrb.gmra.mxu0 %vm506_vm2, %v1644_v58  ;;  %v3717_v42 = vpop.f32.mrf.mxu1 }
 0x596   : > { %2538 = vmatpush.xpose.msk.msrb.mxu1 %vm506_vm2, %v1696_v41  ;;  %3967 = vst [vmem:[#allocation6_spill] sm:$0xff] %v3717_v42 }
 0x597   : > { %2553 = vmatmul.msk.f32.gmra.mxu3 %vm506_vm2, %v1654_v31 }
 0x59c   : > { %v1663_v10 = vpop.permute.xlu0 %1662 }
 0x59d   : > { %v1695_v47 = vsel %vm445_vm3, 1.0, %v1663_v10  ;;  %2535 = vmatmul.msk.f32.gmra.mxu0 %vm506_vm2, %v1645_v51  ;;  %v3723_v10 = vpop.f32.mrf.mxu1 }
 0x59e   : > { %2539 = vmatpush.xpose.msk.msrb.mxu1 %vm506_vm2, %v1695_v47 }
 0x59f   : > { %2554 = vmatmul.msk.f32.gmra.mxu3 %vm506_vm2, %v1655_v30 }
 0x5a5   : > { %2536 = vmatmul.msk.f32.gmra.mxu0 %vm506_vm2, %v1646_v62 }
 0x5b6   : > { %v1413_v3 = vpop.xlane.xlu2 %1412 }
 0x5b7   : > { %2750 = vrcp.f32 %v1413_v3 }
 0x5bd   : > { %v2751_v48 = vpop.eup %2750 }
 0x5be   : > { %v1449_v28 = vmul.f32 %v2751_v48, %v3619_v29  ;;  %v3689_v29 = vpop.f32.mrf.mxu0 }
 0x5c0   : > { %2524 = vmatmul.msk.f32.gmra.mxu1 %vm731_vm5, %v1449_v28 }
 0x5c6   : > { %v3691_v56 = vpop.f32.mrf.mxu0 }
 0x5c8   : > { %2540 = vmatmul.msk.f32.vlgmr.msrb.gmra.mxu1 %vm506_vm2, %v1647_v37 }
 0x5d0   : > { %2541 = vmatmul.msk.f32.gmra.mxu1 %vm506_vm2, %v1648_v46 }
 0x5d8   : > { %2542 = vmatmul.msk.f32.gmra.mxu1 %vm506_vm2, %v1649_v52 }
 0x5ee   : > { %v3703_v49 = vpop.f32.mrf.mxu2 }
 0x5f6   : > { %v3715_v58 = vpop.f32.mrf.mxu2 }
 0x5fa   : > { %v3721_v31 = vpop.f32.mrf.mxu3 }
 0x5fe   : > { %v3719_v41 = vpop.f32.mrf.mxu2 }
 0x602   : > { %v3727_v47 = vpop.f32.mrf.mxu3 }
 0x606   : > { %v3725_v51 = vpop.f32.mrf.mxu2 }
 0x607   : > { %vm1886_vm12 = vcmp.ge.f32.partialorder %v3725_v51, 0.0 }
 0x60a   : > { %v3733_v48 = vpop.f32.mrf.mxu3 }
 0x60e   : > { %v3731_v30 = vpop.f32.mrf.mxu2 }
 0x60f   : > { %vm1887_vm11 = vcmp.ge.f32.partialorder %v3731_v30, 0.0 }
 0x612   : > { %v1739_v2 = vpop.f32.mrf.mxu0 }
 0x613   : > { %vm1880_vm0 = vcmp.ge.f32.partialorder %v1739_v2, 0.0  ;;  %v1892_v43 = vmul.f32 0.2, %v1739_v2 }
 0x615   : > { %v1904_v8 = vsel %vm1880_vm0, %v1739_v2, %v1892_v43  ;;  %v2802_v43 = vld [vmem:[%s3946_s3 + $0x10] sm:$0xff] }
 0x616   : > { %v3699_v45 = vadd.f32 %v3696_v44, %v1904_v8  ;;  %v1833_v11 = vpop.f32.mrf.mxu2 }
 0x617   : > { %vm1888_vm6 = vcmp.ge.f32.partialorder %v1833_v11, 0.0 }
 0x618   : > { %v1928_v55 = vsel %vm731_vm5, %v3699_v45, -inf }
 0x619   : > { %1929 = vmax.xlane.f32.xlu2 %v1928_v55  ;;  %v1900_v55 = vmul.f32 0.2, %v1833_v11 }
 0x61a   : > { %v1742_v27 = vpop.f32.mrf.mxu0 }
 0x61b   : > { %vm1881_vm2 = vcmp.ge.f32.partialorder %v1742_v27, 0.0  ;;  %v1893_v4 = vmul.f32 0.2, %v1742_v27 }
 0x61d   : > { %v1905_v57 = vsel %vm1881_vm2, %v1742_v27, %v1893_v4  ;;  %v1871_v4 = vpop.f32.mrf.mxu3 }
 0x61e   : > { %v3711_v9 = vadd.f32 %v3708_v26, %v1905_v57  ;;  %vm1889_vm8 = vcmp.ge.f32.partialorder %v1871_v4, 0.0 }
 0x620   : > { %v1931_v34 = vsel %vm731_vm5, %v3711_v9, -inf }
 0x621   : > { %1932 = vmax.xlane.f32.xlu1 %v1931_v34 }
 0x622   : > { %v1745_v38 = vpop.f32.mrf.mxu0 }
 0x623   : > { %v1894_v28 = vmul.f32 0.2, %v1745_v38  ;;  %vm1882_vm1 = vcmp.ge.f32.partialorder %v1745_v38, 0.0 }
 0x625   : > { %v1906_v46 = vsel %vm1882_vm1, %v1745_v38, %v1894_v28 }
 0x626   : > { %v3743_v8 = vadd.f32 %v2802_v43, %v1906_v46 }
 0x628   : > { %v1934_v38 = vsel %vm731_vm5, %v3743_v8, -inf }
 0x63d   : > { %v3729_v25 = vpop.f32.mrf.mxu1 }
 0x645   : > { %v1783_v62 = vpop.f32.mrf.mxu1 }
 0x646   : > { %vm1883_vm3 = vcmp.ge.f32.partialorder %v1783_v62, 0.0  ;;  %v1895_v3 = vmul.f32 0.2, %v1783_v62 }
 0x648   : > { %v1907_v7 = vsel %vm1883_vm3, %v1783_v62, %v1895_v3  ;;  %v1912_v62 = vsel %vm1888_vm6, %v1833_v11, %v1900_v55 }
 0x649   : > { %v3736_v37 = vadd.f32 %v3696_v44, %v1907_v7  ;;  %v3752_v7 = vadd.f32 %v2802_v43, %v1912_v62 }
 0x64b   : > { %v1937_v0 = vsel %vm731_vm5, %v3736_v37, -inf  ;;  %v1952_v1 = vsel %vm731_vm5, %v3752_v7, -inf }
 0x64c   : > { %1938 = vmax.xlane.f32.xlu2 %v1937_v0  ;;  %v1901_v0 = vmul.f32 0.2, %v1871_v4 }
 0x64d   : > { %v1786_v52 = vpop.f32.mrf.mxu1 }
 0x64e   : > { %vm1884_vm4 = vcmp.ge.f32.partialorder %v1786_v52, 0.0  ;;  %v1896_v2 = vmul.f32 0.2, %v1786_v52  ;;  %v1913_v11 = vsel %vm1889_vm8, %v1871_v4, %v1901_v0 }
 0x64f   : > { %v3761_v55 = vadd.f32 %v3696_v44, %v1913_v11 }
 0x650   : > { %v1908_v27 = vsel %vm1884_vm4, %v1786_v52, %v1896_v2  ;;  %v1874_v2 = vpop.f32.mrf.mxu3 }
 0x651   : > { %v3746_v57 = vadd.f32 %v3708_v26, %v1908_v27  ;;  %vm1890_vm9 = vcmp.ge.f32.partialorder %v1874_v2, 0.0 }
 0x653   : > { %v1940_v34 = vsel %vm731_vm5, %v3746_v57, -inf }
 0x654   : > { %1941 = vmax.xlane.f32.xlu0 %v1940_v34  ;;  %1935 = vmax.xlane.f32.xlu2 %v1934_v38  ;;  %v1902_v34 = vmul.f32 0.2, %v1874_v2  ;;  %v1955_v38 = vsel %vm731_vm5, %v3761_v55, -inf }
 0x655   : > { %v1789_v3 = vpop.f32.mrf.mxu1 }
 0x656   : > { %vm1885_vm7 = vcmp.ge.f32.partialorder %v1789_v3, 0.0  ;;  %v1897_v28 = vmul.f32 0.2, %v1789_v3  ;;  %v1914_v62 = vsel %vm1890_vm9, %v1874_v2, %v1902_v34 }
 0x658   : > { %v1909_v46 = vsel %vm1885_vm7, %v1789_v3, %v1897_v28  ;;  %v1877_v3 = vpop.f32.mrf.mxu3  ;;  %v3766_v28 = vadd.f32 %v3708_v26, %v1914_v62 }
 0x659   : > { %v3754_v52 = vadd.f32 %v2802_v43, %v1909_v46  ;;  %v1903_v46 = vmul.f32 0.2, %v1877_v3  ;;  %vm1891_vm10 = vcmp.ge.f32.partialorder %v1877_v3, 0.0 }
 0x65b   : > { %v1943_v27 = vsel %vm731_vm5, %v3754_v52, -inf  ;;  %v1915_v4 = vsel %vm1891_vm10, %v1877_v3, %v1903_v46 }
 0x65c   : > { %1944 = vmax.xlane.f32.xlu1 %v1943_v27  ;;  %1953 = vmax.xlane.f32.xlu2 %v1952_v1  ;;  %v1958_v1 = vsel %vm731_vm5, %v3766_v28, -inf  ;;  %v3772_v0 = vadd.f32 %v2802_v43, %v1915_v4  ;;  %v1899_v27 = vmul.f32 0.2, %v3731_v30 }
 0x65e   : > { %v1961_v2 = vsel %vm731_vm5, %v3772_v0, -inf }
 0x664   : > { %1956 = vmax.xlane.f32.xlu2 %v1955_v38 }
 0x668   : > { %2632 = vrot.lane.b32.xlu0 %v3302_v33, %s2816_s23  ;;  %v1911_v33 = vsel %vm1887_vm11, %v3731_v30, %v1899_v27 }
 0x669   : > { %v1923_v34 = vadd.f32 %v3708_v26, %v1911_v33 }
 0x66b   : > { %v1949_v62 = vsel %vm731_vm5, %v1923_v34, -inf }
 0x66c   : > { %1959 = vmax.xlane.f32.xlu2 %v1958_v1 }
 0x674   : > { %1962 = vmax.xlane.f32.xlu2 %v1961_v2 }
 0x675   : > { %2627 = vrot.lane.b32.xlu1 %v3450_v59, %s2816_s23  ;;  %v1898_v59 = vmul.f32 0.2, %v3725_v51 }
 0x677   : > { %v1910_v30 = vsel %vm1886_vm12, %v3725_v51, %v1898_v59 }
 0x68c   : > { %v1930_v11 = vpop.xlane.xlu2 %1929  ;;  %2637 = vrot.lane.b32.xlu2 %v3298_v35, %s2816_s23 }
 0x68d   : > { %v1964_v43 = vsub.f32 %v3699_v45, %v1930_v11  ;;  %v1922_v45 = vadd.f32 %v3696_v44, %v1910_v30 }
 0x68f   : > { %v1976_v38 = vmul.f32 1.442695, %v1964_v43  ;;  %v1946_v26 = vsel %vm731_vm5, %v1922_v45, -inf }
 0x691   : > { %2752 = vpow2.f32 %v1976_v38 }
 0x692   : > { %1950 = vmax.xlane.f32.xlu0 %v1949_v62 }
 0x694   : > { %v3802_v11 = vpop.xlane.xlu1 %1932 }
 0x697   : > { %v3788_v3 = vpop.eup %2752 }
 0x698   : > { %v2000_v35 = vsel %vm731_vm5, %v3788_v3, 0.0 }
 0x69a   : > { %2001 = vadd.xlane.f32.xlu0 %v2000_v35 }
 0x69f   : > { %1947 = vmax.xlane.f32.xlu1 %v1946_v26 }
 0x6bf   : > { %v1939_v46 = vpop.xlane.xlu2 %1938 }
 0x6c0   : > { %v1967_v1 = vsub.f32 %v3736_v37, %v1939_v46 }
 0x6c2   : > { %v1982_v4 = vmul.f32 1.442695, %v1967_v1 }
 0x6c4   : > { %2754 = vpow2.f32 %v1982_v4 }
 0x6c7   : > { %v3796_v2 = vpop.xlane.xlu2 %1935  ;;  %v1942_v43 = vpop.xlane.xlu0 %1941 }
 0x6ca   : > { %v3798_v27 = vpop.eup %2754 }
 0x6cb   : > { %v2009_v51 = vsel %vm731_vm5, %v3798_v27, 0.0 }
 0x6cc   : > { %2010 = vadd.xlane.f32.xlu1 %v2009_v51 }
 0x6cf   : > { %v1954_v33 = vpop.xlane.xlu2 %1953  ;;  %v3804_v38 = vpop.xlane.xlu1 %1944 }
 0x6d7   : > { %v1957_v44 = vpop.xlane.xlu2 %1956 }
 0x6da   : > { %v2633_v37 = vpop.permute.xlu0 %2632 }
 0x6db   : > { %v2635_v46 = vunpack.i.h.bf16 %v2633_v37  ;;  %v2634_v1 = vunpack.i.l.bf16 %v2633_v37 }
 0x6df   : > { %v1960_v62 = vpop.xlane.xlu2 %1959 }
 0x6e5   : > { %2642 = vrot.lane.b32.xlu1 %v3498_v5, %s2816_s23  ;;  %v1968_v5 = vsub.f32 %v3746_v57, %v1942_v43 }
 0x6e7   : > { %v2628_v59 = vpop.permute.xlu1 %2627  ;;  %v3808_v30 = vpop.xlane.xlu2 %1962  ;;  %v1984_v37 = vmul.f32 1.442695, %v1968_v5 }
 0x6e8   : > { %v2630_v35 = vunpack.i.h.bf16 %v2628_v59  ;;  %v2629_v26 = vunpack.i.l.bf16 %v2628_v59 }
 0x6e9   : > { %2756 = vpow2.f32 %v1984_v37 }
 0x6ea   : > { %2179 = vmatpush.msrb.mxu2 %v2629_v26  ;;  %2223 = vmatpush.msrb.mxu3 %v2630_v35 }
 0x6ec   : > { %2180 = vmatpush.msrb.mxu2 %v2634_v1  ;;  %2224 = vmatpush.msrb.mxu3 %v2635_v46  ;;  %v1972_v46 = vsub.f32 %v3752_v7, %v1954_v33  ;;  %v1966_v7 = vsub.f32 %v3743_v8, %v3796_v2  ;;  %v1975_v8 = vsub.f32 %v3772_v0, %v3808_v30 }
 0x6ee   : > { %v1998_v2 = vmul.f32 1.442695, %v1975_v8 }
 0x6ef   : > { %v2638_v4 = vpop.permute.xlu2 %2637 }
 0x6f0   : > { %v2640_v51 = vunpack.i.h.bf16 %v2638_v4  ;;  %v2639_v42 = vunpack.i.l.bf16 %v2638_v4  ;;  %v1992_v4 = vmul.f32 1.442695, %v1972_v46 }
 0x6f2   : > { %2181 = vmatpush.msrb.mxu2 %v2639_v42  ;;  %2225 = vmatpush.msrb.mxu3 %v2640_v51  ;;  %v1973_v42 = vsub.f32 %v3761_v55, %v1957_v44 }
 0x6f4   : > { %2305 = vmatpush.msra.mxu2 %v2952_v21  ;;  %2331 = vmatpush.msra.mxu3 %v2996_v24  ;;  %v3818_v21 = vpop.eup %2756  ;;  %v1994_v24 = vmul.f32 1.442695, %v1973_v42 }
 0x6f6   : > { %2306 = vmatpush.msra.mxu2 %v2946_v20  ;;  %2332 = vmatpush.msra.mxu3 %v2964_v23  ;;  %v2012_v20 = vsel %vm731_vm5, %v3818_v21, 0.0 }
 0x6f8   : > { %2307 = vmatpush.msra.mxu2 %v2940_v19  ;;  %2333 = vmatpush.msra.mxu3 %v2958_v22  ;;  %v1974_v22 = vsub.f32 %v3766_v28, %v1960_v62  ;;  %v1965_v62 = vsub.f32 %v3711_v9, %v3802_v11 }
 0x6fa   : > { %v1978_v37 = vmul.f32 1.442695, %v1965_v62 }
 0x705   : > { %v1951_v59 = vpop.xlane.xlu0 %1950 }
 0x706   : > { %v1971_v35 = vsub.f32 %v1923_v34, %v1951_v59  ;;  %v1996_v34 = vmul.f32 1.442695, %v1974_v22 }
 0x708   : > { %v1990_v26 = vmul.f32 1.442695, %v1971_v35  ;;  %v1980_v35 = vmul.f32 1.442695, %v1966_v7 }
 0x70a   : > { %2758 = vpow2.f32 %v1990_v26 }
 0x70b   : > { %2760 = vpow2.f32 %v1994_v24 }
 0x70d   : > { %v2002_v0 = vpop.xlane.xlu0 %2001 }
 0x70f   : > { %2013 = vadd.xlane.f32.xlu1 %v2012_v20 }
 0x710   : > { %v3822_v19 = vpop.eup %2758 }
 0x711   : > { %v2021_v23 = vsel %vm731_vm5, %v3822_v19, 0.0  ;;  %v2761_v43 = vpop.eup %2760 }
 0x712   : > { %v1948_v57 = vpop.xlane.xlu1 %1947  ;;  %2022 = vadd.xlane.f32.xlu2 %v2021_v23  ;;  %v2027_v1 = vsel %vm731_vm5, %v2761_v43, 0.0 }
 0x713   : > { %v1970_v55 = vsub.f32 %v1922_v45, %v1948_v57 }
 0x715   : > { %v1988_v44 = vmul.f32 1.442695, %v1970_v55 }
 0x717   : > { %2762 = vpow2.f32 %v1988_v44 }
 0x718   : > { %2764 = vpow2.f32 %v1996_v34  ;;  %v1969_v34 = vsub.f32 %v3754_v52, %v3804_v38 }
 0x719   : > { %2766 = vpow2.f32 %v1992_v4 }
 0x71a   : > { %2028 = vadd.xlane.f32.xlu2 %v2027_v1  ;;  %2768 = vpow2.f32 %v1978_v37  ;;  %v1986_v30 = vmul.f32 1.442695, %v1969_v34 }
 0x71b   : > { %2770 = vpow2.f32 %v1980_v35 }
 0x71c   : > { %2772 = vpow2.f32 %v1998_v2 }
 0x71d   : > { %v2763_v51 = vpop.eup %2762 }
 0x71e   : > { %v2765_v5 = vpop.eup %2764  ;;  %v2018_v28 = vsel %vm731_vm5, %v2763_v51, 0.0 }
 0x71f   : > { %2019 = vadd.xlane.f32.xlu0 %v2018_v28  ;;  %v2030_v45 = vsel %vm731_vm5, %v2765_v5, 0.0  ;;  %v2767_v59 = vpop.eup %2766 }
 0x720   : > { %v2024_v33 = vsel %vm731_vm5, %v2767_v59, 0.0  ;;  %v3836_v42 = vpop.eup %2768 }
 0x721   : > { %v2003_v9 = vsel %vm731_vm5, %v3836_v42, 0.0  ;;  %v3842_v11 = vpop.eup %2770 }
 0x722   : > { %2031 = vadd.xlane.f32.xlu2 %v2030_v45  ;;  %v2006_v26 = vsel %vm731_vm5, %v3842_v11, 0.0  ;;  %v2773_v57 = vpop.eup %2772 }
 0x72a   : > { %2025 = vadd.xlane.f32.xlu2 %v2024_v33 }
 0x732   : > { %2004 = vadd.xlane.f32.xlu2 %v2003_v9 }
 0x733   : > { %2647 = vrot.lane.b32.xlu0 %v3468_v39, %s2816_s23  ;;  %v2033_v39 = vsel %vm731_vm5, %v2773_v57, 0.0 }
 0x73a   : > { %2007 = vadd.xlane.f32.xlu2 %v2006_v26 }
 0x73f   : > { %v2011_v24 = vpop.xlane.xlu1 %2010 }
 0x757   : > { %v2643_v20 = vpop.permute.xlu1 %2642 }
 0x758   : > { %v2645_v22 = vunpack.i.h.bf16 %v2643_v20  ;;  %v2644_v23 = vunpack.i.l.bf16 %v2643_v20 }
 0x75a   : > { %2091 = vmatpush.msra.mxu0 %v2644_v23  ;;  %2135 = vmatpush.msra.mxu1 %v2645_v22 }
 0x75d   : > { %2034 = vadd.xlane.f32.xlu0 %v2033_v39 }
 0x771   : > { %2652 = vrot.lane.b32.xlu0 %v3551_v6, %s2816_s23 }
 0x782   : > { %v2014_v22 = vpop.xlane.xlu1 %2013 }
 0x785   : > { %v2023_v55 = vpop.xlane.xlu2 %2022 }
 0x78d   : > { %v2029_v44 = vpop.xlane.xlu2 %2028 }
 0x78e   : > { %2774 = vrcp.f32 %v2029_v44 }
 0x78f   : > { %2776 = vpow2.f32 %v1986_v30 }
 0x792   : > { %v2020_v46 = vpop.xlane.xlu0 %2019 }
 0x793   : > { %2778 = vrcp.f32 %v2020_v46 }
 0x794   : > { %v2775_v1 = vpop.eup %2774 }
 0x795   : > { %v2057_v4 = vmul.f32 %v2775_v1, %v2761_v43  ;;  %v2032_v28 = vpop.xlane.xlu2 %2031  ;;  %v3853_v62 = vpop.eup %2776 }
 0x796   : > { %2780 = vrcp.f32 %v2032_v28  ;;  %v2015_v52 = vsel %vm731_vm5, %v3853_v62, 0.0 }
 0x797   : > { %2564 = vmatmul.msk.f32.vlgmr.msrb.gmra.mxu3 %vm731_vm5, %v2057_v4  ;;  %2782 = vrcp.f32 %v2023_v55 }
 0x799   : > { %v2779_v6 = vpop.eup %2778 }
 0x79a   : > { %v2054_v45 = vmul.f32 %v2779_v6, %v2763_v51 }
 0x79b   : > { %2016 = vadd.xlane.f32.xlu0 %v2015_v52 }
 0x79c   : > { %v2781_v38 = vpop.eup %2780  ;;  %2561 = vmatmul.msk.f32.vlgmr.msrb.gmra.mxu2 %vm731_vm5, %v2054_v45 }
 0x79d   : > { %v2058_v37 = vmul.f32 %v2781_v38, %v2765_v5  ;;  %v2026_v7 = vpop.xlane.xlu2 %2025  ;;  %v2783_v33 = vpop.eup %2782 }
 0x79e   : > { %2784 = vrcp.f32 %v2026_v7  ;;  %v2055_v43 = vmul.f32 %v2783_v33, %v3822_v19 }
 0x79f   : > { %2565 = vmatmul.msk.f32.gmra.mxu3 %vm731_vm5, %v2058_v37 }
 0x7a4   : > { %2562 = vmatmul.msk.f32.gmra.mxu2 %vm731_vm5, %v2055_v43  ;;  %v2785_v26 = vpop.eup %2784 }
 0x7a5   : > { %v2648_v35 = vpop.permute.xlu0 %2647  ;;  %v2056_v8 = vmul.f32 %v2785_v26, %v2767_v59  ;;  %v2005_v19 = vpop.xlane.xlu2 %2004 }
 0x7a6   : > { %v2650_v9 = vunpack.i.h.bf16 %v2648_v35  ;;  %v2649_v51 = vunpack.i.l.bf16 %v2648_v35 }
 0x7a8   : > { %2092 = vmatpush.msra.mxu0 %v2649_v51  ;;  %2136 = vmatpush.msra.mxu1 %v2650_v9 }
 0x7ac   : > { %2563 = vmatmul.msk.f32.gmra.mxu2 %vm731_vm5, %v2056_v8 }
 0x7d0   : > { %v2035_v2 = vpop.xlane.xlu0 %2034 }
 0x7d1   : > { %2786 = vrcp.f32 %v2035_v2 }
 0x7d2   : > { %2788 = vrcp.f32 %v2002_v0 }
 0x7d3   : > { %2790 = vrcp.f32 %v2011_v24 }
 0x7d4   : > { %2792 = vrcp.f32 %v2014_v22 }
 0x7d5   : > { %2794 = vrcp.f32 %v2005_v19 }
 0x7d7   : > { %v2787_v5 = vpop.eup %2786 }
 0x7d8   : > { %v2059_v20 = vmul.f32 %v2787_v5, %v2773_v57  ;;  %v2789_v23 = vpop.eup %2788  ;;  %v2008_v57 = vpop.xlane.xlu2 %2007 }
 0x7d9   : > { %v2791_v39 = vpop.eup %2790  ;;  %v2048_v59 = vmul.f32 %v2789_v23, %v3788_v3  ;;  %2796 = vrcp.f32 %v2008_v57 }
 0x7da   : > { %2566 = vmatmul.msk.f32.gmra.mxu3 %vm731_vm5, %v2059_v20  ;;  %v2051_v44 = vmul.f32 %v2791_v39, %v3798_v27  ;;  %v2793_v24 = vpop.eup %2792 }
 0x7db   : > { %v2795_v0 = vpop.eup %2794  ;;  %v2052_v27 = vmul.f32 %v2793_v24, %v3818_v21 }
 0x7dc   : > { %v2049_v3 = vmul.f32 %v2795_v0, %v3836_v42 }
 0x7e3   : > { %v2653_v55 = vpop.permute.xlu0 %2652 }
 0x7e4   : > { %v2655_v34 = vunpack.i.h.bf16 %v2653_v55  ;;  %v2654_v30 = vunpack.i.l.bf16 %v2653_v55 }
 0x7e6   : > { %2093 = vmatpush.msra.mxu0 %v2654_v30  ;;  %2137 = vmatpush.msra.mxu1 %v2655_v34 }
 0x7e7   : > { %2555 = vmatmul.msk.f32.vlgmr.msra.gmra.mxu0 %vm731_vm5, %v2048_v59  ;;  %2558 = vmatmul.msk.f32.vlgmr.msra.gmra.mxu1 %vm731_vm5, %v2051_v44 }
 0x7e8   : > { %2253 = vmatpush.msrb.mxu0 %v2920_v15  ;;  %2279 = vmatpush.msrb.mxu1 %v2934_v18  ;;  %v2797_v15 = vpop.eup %2796 }
 0x7e9   : > { %v2050_v18 = vmul.f32 %v2797_v15, %v3842_v11 }
 0x7ea   : > { %2254 = vmatpush.msrb.mxu0 %v2916_v14  ;;  %2280 = vmatpush.msrb.mxu1 %v2928_v17 }
 0x7ec   : > { %2255 = vmatpush.msrb.mxu0 %v2912_v13  ;;  %2281 = vmatpush.msrb.mxu1 %v2924_v16 }
 0x7ef   : > { %2556 = vmatmul.msk.f32.gmra.mxu0 %vm731_vm5, %v2049_v3  ;;  %2559 = vmatmul.msk.f32.gmra.mxu1 %vm731_vm5, %v2052_v27 }
 0x7f7   : > { %2557 = vmatmul.msk.f32.gmra.mxu0 %vm731_vm5, %v2050_v18 }
 0x80e   : > { %v2017_v14 = vpop.xlane.xlu0 %2016 }
 0x80f   : > { %2798 = vrcp.f32 %v2017_v14 }
 0x815   : > { %v2799_v17 = vpop.eup %2798 }
 0x816   : > { %v2053_v13 = vmul.f32 %v2799_v17, %v3853_v62 }
 0x818   : > { %2560 = vmatmul.msk.f32.gmra.mxu1 %vm731_vm5, %v2053_v13  ;;  %vm2239_vm5 = vcmask 785408  }
 0x81a   : > { %v2227_v21 = vpop.f32.mrf.mxu3 }
 0x81f   : > { %v2183_v16 = vpop.f32.mrf.mxu2 }
 0x822   : > { %v2230_v11 = vpop.f32.mrf.mxu3 }
 0x827   : > { %v2186_v42 = vpop.f32.mrf.mxu2 }
 0x82f   : > { %v2189_v46 = vpop.f32.mrf.mxu2 }
 0x830   : > { %2308 = vmatpush.msra.mxu2 %v2189_v46 }
 0x832   : > { %2309 = vmatpush.msra.mxu2 %v2186_v42 }
 0x834   : > { %2310 = vmatpush.msra.mxu2 %v2183_v16 }
 0x836   : > { %2311 = vmatpush.msra.mxu2 %v3719_v41 }
 0x838   : > { %2312 = vmatpush.msra.mxu2 %v3715_v58 }
 0x83a   : > { %2313 = vmatpush.msra.mxu2 %v3703_v49 }
 0x83c   : > { %2314 = vmatpush.msra.mxu2 %v3474_v54 }
 0x83e   : > { %2315 = vmatpush.msra.mxu2 %v3464_v32  ;;  %v2236_v32 = vld [vmem:[%s3947_s4] sm:$0xff] }
 0x840   : > { %2316 = vmatpush.msra.mxu2 %v3458_v12 }
 0x841   : > { %2573 = vmatmul.msk.f32.vlgmr.msra.gmra.mxu2 %vm2239_vm5, %v2236_v32 }
 0x85d   : > { %v2233_v1 = vpop.f32.mrf.mxu3 }
 0x85e   : > { %2334 = vmatpush.msra.mxu3 %v2233_v1 }
 0x860   : > { %2335 = vmatpush.msra.mxu3 %v2230_v11 }
 0x862   : > { %2336 = vmatpush.msra.mxu3 %v2227_v21 }
 0x864   : > { %v2095_v4 = vpop.f32.mrf.mxu0  ;;  %2337 = vmatpush.msra.mxu3 %v3733_v48 }
 0x866   : > { %2338 = vmatpush.msra.mxu3 %v3727_v47 }
 0x868   : > { %2339 = vmatpush.msra.mxu3 %v3721_v31 }
 0x86a   : > { %2340 = vmatpush.msra.mxu3 %v3476_v63  ;;  %v2238_v63 = vld [vmem:[%s3947_s4 + $0x10] sm:$0x1f] }
 0x86c   : > { %v2098_v54 = vpop.f32.mrf.mxu0  ;;  %2341 = vmatpush.msra.mxu3 %v3472_v36 }
 0x86e   : > { %2342 = vmatpush.msra.mxu3 %v3462_v53  ;;  %v2139_v53 = vpop.f32.mrf.mxu1 }
 0x86f   : > { %2576 = vmatmul.msk.f32.vlgmr.msra.gmra.mxu3 %vm2239_vm5, %v2236_v32 }
 0x874   : > { %v2101_v12 = vpop.f32.mrf.mxu0 }
 0x875   : > { %2256 = vmatpush.msrb.mxu0 %v2101_v12 }
 0x876   : > { %v2142_v36 = vpop.f32.mrf.mxu1 }
 0x877   : > { %2257 = vmatpush.msrb.mxu0 %v2098_v54 }
 0x879   : > { %2258 = vmatpush.msrb.mxu0 %v2095_v4 }
 0x87b   : > { %2259 = vmatpush.msrb.mxu0 %v3691_v56  ;;  %v3971_v56 = vld [vmem:[#allocation7_spill] sm:$0xff] }
 0x87d   : > { %2260 = vmatpush.msrb.mxu0 %v3689_v29  ;;  %v3970_v29 = vld [vmem:[#allocation8_spill] sm:$0xff] }
 0x87f   : > { %2261 = vmatpush.msrb.mxu0 %v3687_v60  ;;  %v3969_v60 = vld [vmem:[#allocation9_spill] sm:$0xff] }
 0x881   : > { %2262 = vmatpush.msrb.mxu0 %v3446_v40  ;;  %v2237_v40 = vld [vmem:[%s3947_s4 + $0x8] sm:$0xff] }
 0x882   : > { %2574 = vmatmul.msk.f32.gmra.mxu2 %vm2239_vm5, %v2237_v40  ;;  %2577 = vmatmul.msk.f32.gmra.mxu3 %vm2239_vm5, %v2237_v40 }
 0x883   : > { %2263 = vmatpush.msrb.mxu0 %v3440_v61  ;;  %v3968_v61 = vld [vmem:[#allocation6_spill] sm:$0xff] }
 0x885   : > { %2264 = vmatpush.msrb.mxu0 %v3438_v50 }
 0x886   : > { %2567 = vmatmul.msk.f32.vlgmr.msrb.gmra.mxu0 %vm2239_vm5, %v2236_v32 }
 0x88a   : > { %2575 = vmatmul.msk.f32.gmra.mxu2 %vm2239_vm5, %v2238_v63  ;;  %2578 = vmatmul.msk.f32.gmra.mxu3 %vm2239_vm5, %v2238_v63 }
 0x88e   : > { %2568 = vmatmul.msk.f32.gmra.mxu0 %vm2239_vm5, %v2237_v40 }
 0x895   : > { %v2145_v50 = vpop.f32.mrf.mxu1 }
 0x896   : > { %2282 = vmatpush.msrb.mxu1 %v2145_v50  ;;  %2569 = vmatmul.msk.f32.gmra.mxu0 %vm2239_vm5, %v2238_v63 }
 0x898   : > { %2283 = vmatpush.msrb.mxu1 %v2142_v36 }
 0x89a   : > { %2284 = vmatpush.msrb.mxu1 %v2139_v53 }
 0x89c   : > { %2285 = vmatpush.msrb.mxu1 %v3729_v25 }
 0x89e   : > { %2286 = vmatpush.msrb.mxu1 %v3723_v10 }
 0x8a0   : > { %2287 = vmatpush.msrb.mxu1 %v3968_v61 }
 0x8a2   : > { %2288 = vmatpush.msrb.mxu1 %v3969_v60 }
 0x8a4   : > { %2289 = vmatpush.msrb.mxu1 %v3970_v29 }
 0x8a6   : > { %2290 = vmatpush.msrb.mxu1 %v3971_v56 }
 0x8a7   : > { %2570 = vmatmul.msk.f32.vlgmr.msrb.gmra.mxu1 %vm2239_vm5, %v2236_v32 }
 0x8af   : > { %2571 = vmatmul.msk.f32.gmra.mxu1 %vm2239_vm5, %v2237_v40 }
 0x8b7   : > { %2572 = vmatmul.msk.f32.gmra.mxu1 %vm2239_vm5, %v2238_v63 }
 0x8c4   : > { %v2318_v58 = vpop.f32.mrf.mxu2 }
 0x8c5   : > { %2361 = vst.msk [vmem:[%s228_s9 + $0x30] sm:$0xff] %vm2353_vm13, %v2318_v58 }
 0x8f2   : > { %v2344_v41 = vpop.f32.mrf.mxu3 }
 0x8f3   : > { %2364 = vst.msk [vmem:[%s228_s9 + $0x48] sm:$0xff] %vm2353_vm13, %v2344_v41 }
 0x903   : > { %v2266_v49 = vpop.f32.mrf.mxu0 }
 0x904   : > { %2354 = vst.msk [vmem:[%s228_s9] sm:$0xff] %vm2353_vm13, %v2266_v49 }
 0x905   : > { %v2321_v10 = vpop.f32.mrf.mxu2  ;;  %v2347_v47 = vpop.f32.mrf.mxu3 }
 0x906   : > { %2362 = vst.msk [vmem:[%s228_s9 + $0x38] sm:$0xff] %vm2353_vm13, %v2321_v10 }
 0x907   : > { %2365 = vst.msk [vmem:[%s228_s9 + $0x50] sm:$0xff] %vm2353_vm13, %v2347_v47 }
 0x90b   : > { %v2269_v31 = vpop.f32.mrf.mxu0 }
 0x90c   : > { %2355 = vst.msk [vmem:[%s228_s9 + $0x8] sm:$0xff] %vm2353_vm13, %v2269_v31 }
 0x90d   : > { %v2324_v48 = vpop.f32.mrf.mxu2  ;;  %v2350_v28 = vpop.f32.mrf.mxu3 }
 0x90e   : > { %2363 = vst.msk [vmem:[%s228_s9 + $0x40] sm:$0x1f] %vm2356_vm14, %v2324_v48 }
 0x90f   : > { %2366 = vst.msk [vmem:[%s228_s9 + $0x58] sm:$0x1f] %vm2356_vm14, %v2350_v28 }
 0x913   : > { %v2272_v25 = vpop.f32.mrf.mxu0 }
 0x914   : > { %2357 = vst.msk [vmem:[%s228_s9 + $0x10] sm:$0x1f] %vm2356_vm14, %v2272_v25 }
 0x924   : > { %v2292_v62 = vpop.f32.mrf.mxu1 }
 0x925   : > { %2358 = vst.msk [vmem:[%s228_s9 + $0x18] sm:$0xff] %vm2353_vm13, %v2292_v62 }
 0x92c   : > { %v2295_v6 = vpop.f32.mrf.mxu1 }
 0x92d   : > { %2359 = vst.msk [vmem:[%s228_s9 + $0x20] sm:$0xff] %vm2353_vm13, %v2295_v6 }
 0x934   : > { %v2298_v45 = vpop.f32.mrf.mxu1 }
 0x935   : > { %2360 = vst.msk [vmem:[%s228_s9 + $0x28] sm:$0x1f] %vm2356_vm14, %v2298_v45 }
 0x936 PF: > { %s15_s18 = sadd.s32 1, %s2809_s18  }
 0x937   : > { %p12_p5 = scmp.ge.s32.totalorder %s15_s18, 6  }
 0x939   :  { %14 = sbr.rel (!%p12_p5) target bundleno = 1 (0x1), region = 70 }

</bundles_post_ra>
